<compile_context>
chip_gen: v5e
topology: v5e:2x2
jax: 0.10.0
libtpu: 0.0.40
codegen_flags: <defaults>
</compile_context>

<pallas_src>
import functools
import math

import jax
import jax.numpy as jnp
from jax import lax
from jax.experimental import pallas as pl
from jax.experimental.pallas import tpu as pltpu


def _sobel_kernels(angle=0.0):
    # dx = outer([1,2,1],[-1,0,1]) / 8 ; dy = dx.T ; rotated by `angle`.
    dx = [[v * h / 8.0 for h in (-1.0, 0.0, 1.0)] for v in (1.0, 2.0, 1.0)]
    dy = [[dx[j][i] for j in range(3)] for i in range(3)]
    c, s = math.cos(angle), math.sin(angle)
    kx = [[c * dx[i][j] - s * dy[i][j] for j in range(3)] for i in range(3)]
    ky = [[s * dx[i][j] + c * dy[i][j] for j in range(3)] for i in range(3)]
    return kx, ky


_TAPS = tuple((di, dj) for di in (-1, 0, 1) for dj in (-1, 0, 1))


def _ca_kernel(x_ref, um_ref, wt_ref, b1_ref, w2_ref, b2_ref, out_ref,
               pmat_ref, *, H, W, C, bpb, n_steps, alive_thresh, mxu_bf16):
    """One grid block = `bpb` images packed on lanes, rolled `n_steps` times."""
    L = bpb * H * W

    # Per-lane (row, col) *within each packed image* — used to zero pixels a
    # lane roll would otherwise pull across an image border (or across packed
    # image boundaries).
    lane = lax.broadcasted_iota(jnp.int32, (1, L), 1)
    if (W & (W - 1)) == 0 and (H & (H - 1)) == 0:       # power-of-two fast path
        col = jnp.bitwise_and(lane, W - 1)
        row = jnp.bitwise_and(jnp.right_shift(lane, int(math.log2(W))), H - 1)
    else:
        col = lane % W
        row = (lane // W) % H
    cmask = {-1: col > 0, 1: col < W - 1}
    rmask = {-1: row > 0, 1: row < H - 1}

    def shift(a, di, dj):
        # a'[.., r, c] = a[.., r+di, c+dj], zero outside the image.  One fused
        # lane roll (XLU) + one combined select (VPU), even for corner taps.
        # Zero fill == conv zero padding; it is also equivalent to -inf for the
        # 3x3 max-pool because alive_thresh (0.1) > 0.
        v = pltpu.roll(a, (-(di * W + dj)) % L, axis=1)
        m = None
        if dj != 0:
            m = cmask[dj]
        if di != 0:
            m = rmask[di] if m is None else jnp.logical_and(m, rmask[di])
        return jnp.where(m, v, 0.0)

    def mm(a, b):
        if mxu_bf16:  # v6e/v7x option: MXU is natively bf16; f32 elsewhere.
            a = a.astype(jnp.bfloat16)
            b = b.astype(jnp.bfloat16)
        return jnp.dot(a, b, preferred_element_type=jnp.float32)

    # The NCA state lives in the resident VMEM output block across all steps.
    out_ref[...] = x_ref[...]

    def step(t, carry):
        x = out_ref[...]                                 # (C, L)
        alpha_max = x[3:4, :]

        # Perceive taps staged straight into VMEM scratch (caps vreg pressure)
        # while accumulating the pre-update 3x3 alpha max-pool on the fly.
        for k, (di, dj) in enumerate(_TAPS):
            if di == 0 and dj == 0:
                p = x
            else:
                p = shift(x, di, dj)
                alpha_max = jnp.maximum(alpha_max, p[3:4, :])
            pmat_ref[k * C:(k + 1) * C, :] = p
        pre_alive = alpha_max > alive_thresh

        # dmodel: fused perceive+conv1 -> ReLU6 -> conv2 (step_size folded).
        h = mm(wt_ref[...], pmat_ref[...]) + b1_ref[...]
        h = jnp.clip(h, 0.0, 6.0)
        dx = mm(w2_ref[...], h) + b2_ref[...]

        um = um_ref[t]                                   # (1, L) fire mask
        new_x = x + dx * um

        # Post-update life mask: 3x3 max-pool of the new alpha channel.
        na = new_x[3:4, :]
        post_max = na
        for di, dj in _TAPS:
            if di == 0 and dj == 0:
                continue
            post_max = jnp.maximum(post_max, shift(na, di, dj))
        life = jnp.logical_and(pre_alive, post_max > alive_thresh)

        out_ref[...] = jnp.where(life, new_x, 0.0)
        return carry

    if n_steps <= 8:
        # Short fixed rollouts: unroll (gives the scheduler full visibility and
        # keeps the kernel portable to the CPU interpret fallback).
        for t in range(n_steps):
            step(t, 0)
    else:
        lax.fori_loop(0, n_steps, step, 0)


def init_params(key, channel_n, hidden):
    """Conv2d(3C, hidden, 1) with torch default init; final conv zero-init."""
    fan_in = 3 * channel_n
    bound = 1.0 / math.sqrt(fan_in)
    k1, k2 = jax.random.split(key)
    w1 = jax.random.uniform(k1, (fan_in, hidden), jnp.float32, -bound, bound)
    b1 = jax.random.uniform(k2, (hidden,), jnp.float32, -bound, bound)
    # Matches CAModel._init_weights: final conv weight and bias are zeros.
    w2 = jnp.zeros((hidden, channel_n), jnp.float32)
    b2 = jnp.zeros((channel_n,), jnp.float32)
    return w1, b1, w2, b2


def prepare_params(params, *, angle=0.0, step_size=1.0):
    """Fold perceive (identity/sobel taps) into conv1 and step_size into conv2.
    Call once at init time, not per forward call."""
    w1, b1, w2, b2 = params
    c3, hid = w1.shape
    C = c3 // 3
    kx, ky = _sobel_kernels(angle)
    w_id, w_x, w_y = w1[:C], w1[C:2 * C], w1[2 * C:]
    taps = []
    for i in range(3):
        for j in range(3):
            t = kx[i][j] * w_x + ky[i][j] * w_y
            if i == 1 and j == 1:
                t = t + w_id
            taps.append(t.T)                                   # (hid, C)
    wt = jnp.concatenate(taps, axis=1).astype(jnp.float32)     # (hid, 9C)
    return (wt,
            b1.reshape(hid, 1).astype(jnp.float32),
            (w2.T * step_size).astype(jnp.float32),            # (C, hid)
            (b2.reshape(-1, 1) * step_size).astype(jnp.float32))


def ca_nca_rollout(x_nchw, prepared, update_masks, *, alive_thresh=0.1,
                   num_blocks=None, mxu_bf16=False):
    """Run n_steps = update_masks.shape[0] fused CAModel.call steps in ONE
    pallas_call.  update_masks: (n_steps, B, 1, H, W) float {0,1} fire masks
    (the torch.rand(...) <= fire_rate draw, one per step)."""
    wt, b1c, w2t, b2c = prepared
    B, C, H, W = x_nchw.shape
    HW = H * W
    hid = wt.shape[0]
    n_steps = int(update_masks.shape[0])
    assert C >= 4, "alpha channel lives at index 3"
    assert n_steps >= 1

    # 2-way batch split keeps both v7x TensorCores busy; costs nothing on the
    # single-TC v5e/v6e (just two serial grid steps with everything resident).
    if num_blocks is None:
        num_blocks = 2 if (B >= 2 and B % 2 == 0) else 1
    assert B % num_blocks == 0
    bpb = B // num_blocks
    Lb = bpb * HW
    assert Lb % 128 == 0, "pixels per block must be lane-aligned (mult. of 128)"
    # NOTE: for very large H*W on v7x (64 MiB VMEM) tile the grid over pixel
    # blocks and set vmem_limit_bytes explicitly; not needed at these sizes.

    # Pack the batch onto the lane axis: (B,C,H,W) -> (C, B*H*W), lane-dense.
    x2 = jnp.transpose(x_nchw, (1, 0, 2, 3)).reshape(C, B * HW)
    x2 = x2.astype(jnp.float32)
    um2 = update_masks.astype(jnp.float32).reshape(n_steps, 1, B * HW)

    kernel = functools.partial(_ca_kernel, H=H, W=W, C=C, bpb=bpb,
                               n_steps=n_steps,
                               alive_thresh=float(alive_thresh),
                               mxu_bf16=bool(mxu_bf16))

    out2 = pl.pallas_call(
        kernel,
        out_shape=jax.ShapeDtypeStruct((C, B * HW), jnp.float32),
        grid_spec=pltpu.PrefetchScalarGridSpec(
            num_scalar_prefetch=0,
            grid=(num_blocks,),
            in_specs=[
                pl.BlockSpec((C, Lb), lambda g: (0, g)),            # state
                pl.BlockSpec((n_steps, 1, Lb), lambda g: (0, 0, g)),  # masks
                pl.BlockSpec((hid, 9 * C), lambda g: (0, 0)),       # conv1 (folded)
                pl.BlockSpec((hid, 1), lambda g: (0, 0)),
                pl.BlockSpec((C, hid), lambda g: (0, 0)),           # conv2
                pl.BlockSpec((C, 1), lambda g: (0, 0)),
            ],
            out_specs=pl.BlockSpec((C, Lb), lambda g: (0, g)),
            scratch_shapes=[pltpu.VMEM((9 * C, Lb), jnp.float32)],  # staged taps
        ),
        compiler_params=pltpu.CompilerParams(
            dimension_semantics=("parallel",)),
    )(x2, um2, wt, b1c, w2t, b2c)

    return jnp.transpose(out2.reshape(C, B, H, W), (1, 0, 2, 3))


# ----------------------------- plain-JAX reference --------------------------

def reference_step(x, params, um, *, angle=0.0, step_size=1.0,
                   alive_thresh=0.1):
    """NCHW reference of CAModel.call, given the per-step fire mask."""
    w1, b1, w2, b2 = params
    B, C, H, W = x.shape
    kx, ky = _sobel_kernels(angle)
    xp = jnp.pad(x, ((0, 0), (0, 0), (1, 1), (1, 1)))
    sx = sum(kx[i][j] * xp[:, :, i:i + H, j:j + W]
             for i in range(3) for j in range(3) if kx[i][j] != 0.0)
    sy = sum(ky[i][j] * xp[:, :, i:i + H, j:j + W]
             for i in range(3) for j in range(3) if ky[i][j] != 0.0)
    y = jnp.concatenate([x, sx, sy], axis=1)                   # (B, 3C, H, W)
    h = jnp.einsum('bkhw,kd->bdhw', y, w1) + b1[None, :, None, None]
    h = jnp.clip(h, 0.0, 6.0)
    dxv = (jnp.einsum('bdhw,dc->bchw', h, w2)
           + b2[None, :, None, None]) * step_size

    def maxpool3(a):                                           # (B, 1, H, W)
        ap = jnp.pad(a, ((0, 0), (0, 0), (1, 1), (1, 1)),
                     constant_values=-jnp.inf)
        return jnp.max(jnp.stack([ap[:, :, i:i + H, j:j + W]
                                  for i in range(3) for j in range(3)], 0), 0)

    pre = maxpool3(x[:, 3:4]) > alive_thresh
    new_x = x + dxv * um
    post = maxpool3(new_x[:, 3:4]) > alive_thresh
    return new_x * jnp.logical_and(pre, post).astype(jnp.float32)


def reference_rollout(x, params, masks, *, angle=0.0, step_size=1.0,
                      alive_thresh=0.1):
    for t in range(masks.shape[0]):
        x = reference_step(x, params, masks[t], angle=angle,
                           step_size=step_size, alive_thresh=alive_thresh)
    return x


# ----------------------------------- demo -----------------------------------

if __name__ == "__main__":
    B, C, H, W = 4, 8, 16, 16      # channel_n = 8 (alpha channel index 3)
    HIDDEN = 32                    # hidden_sizes = (32,)
    FIRE_RATE = 0.5
    N_STEPS = 5

    key = jax.random.PRNGKey(0)
    k_x, k_p, k_w2, k_b2, k_m = jax.random.split(key, 5)
    x = jax.random.normal(k_x, (B, C, H, W), jnp.float32)

    # Per-step fire masks, identical to torch.rand(x[:, :1].shape) <= fire_rate.
    masks = (jax.random.uniform(k_m, (N_STEPS, B, 1, H, W)) <= FIRE_RATE
             ).astype(jnp.float32)

    # Test 1: true module init (final conv zero -> dx == 0 path).
    params0 = init_params(k_p, C, HIDDEN)
    # Tests 2/3: non-zero final conv to exercise the full dmodel path.  The
    # alpha column stays zero so the >0.1 life-mask comparisons are bit-exact
    # between kernel and reference (no threshold flips from fp rounding).
    w1, b1, _, _ = params0
    w2r = 0.02 * jax.random.normal(k_w2, (HIDDEN, C), jnp.float32)
    b2r = 0.02 * jax.random.normal(k_b2, (C,), jnp.float32)
    w2r = w2r.at[:, 3].set(0.0)
    b2r = b2r.at[3].set(0.0)
    params1 = (w1, b1, w2r, b2r)

    tests = [
        ("zero-init single step", params0, 1, 1e-4),
        ("dense single step", params1, 1, 1e-4),
        ("dense fused 5-step rollout", params1, N_STEPS, None),
    ]
    for name, params, n, tol in tests:
        prep = prepare_params(params, angle=0.0, step_size=1.0)
        out = ca_nca_rollout(x, prep, masks[:n])
        out = jax.block_until_ready(out)
        ref = reference_rollout(x, params, masks[:n], angle=0.0, step_size=1.0)
        assert out.shape == (B, C, H, W)
        err = float(jnp.max(jnp.abs(out - ref)))
        bound = tol if tol is not None else (
            2e-3 * (1.0 + float(jnp.max(jnp.abs(ref)))))
        assert err < bound, f"{name}: max abs err {err} (bound {bound})"

    print("KERNEL_OK")
</pallas_src>

<mosaic_0001>
module attributes {stable_mosaic.version = 11 : i64} {
  func.func @_ca_kernel(%arg0: i32, %arg1: memref<8x512xf32, #tpu.memory_space<vmem>>, %arg2: memref<1x1x512xf32, #tpu.memory_space<vmem>>, %arg3: memref<32x72xf32, #tpu.memory_space<vmem>>, %arg4: memref<32x1xf32, #tpu.memory_space<vmem>>, %arg5: memref<8x32xf32, #tpu.memory_space<vmem>>, %arg6: memref<8x1xf32, #tpu.memory_space<vmem>>, %arg7: memref<8x512xf32, #tpu.memory_space<vmem>>, %arg8: memref<72x512xf32, #tpu.memory_space<vmem>>) attributes {dimension_semantics = [#tpu.dimension_semantics<parallel>], iteration_bounds = array<i64: 2>, scalar_prefetch = 0 : i64, scratch_operands = 1 : i64, tpu.core_type = #tpu.core_type<tc>, window_params = [{transform_indices = @transform_0, window_bounds = array<i64: 8, 512>}, {transform_indices = @transform_1, window_bounds = array<i64: 1, 1, 512>}, {pipeline_mode = #tpu.pipeline_mode<synchronous>, transform_indices = @transform_2, window_bounds = array<i64: 32, 72>}, {pipeline_mode = #tpu.pipeline_mode<synchronous>, transform_indices = @transform_3, window_bounds = array<i64: 32, 1>}, {pipeline_mode = #tpu.pipeline_mode<synchronous>, transform_indices = @transform_4, window_bounds = array<i64: 8, 32>}, {pipeline_mode = #tpu.pipeline_mode<synchronous>, transform_indices = @transform_5, window_bounds = array<i64: 8, 1>}, {transform_indices = @transform_6, window_bounds = array<i64: 8, 512>}]} {
    %0 = tpu.iota {dimensions = array<i32: 1>} : vector<1x512xi32>
    %c15_i32 = arith.constant 15 : i32
    %1 = vector.broadcast %c15_i32 : i32 to vector<1x512xi32>
    %2 = arith.andi %0, %1 : vector<1x512xi32>
    %c4_i32 = arith.constant 4 : i32
    %3 = vector.broadcast %c4_i32 : i32 to vector<1x512xi32>
    %4 = arith.shrsi %0, %3 : vector<1x512xi32>
    %c15_i32_0 = arith.constant 15 : i32
    %5 = vector.broadcast %c15_i32_0 : i32 to vector<1x512xi32>
    %6 = arith.andi %4, %5 : vector<1x512xi32>
    %c0_i32 = arith.constant 0 : i32
    %7 = vector.broadcast %c0_i32 : i32 to vector<1x512xi32>
    %8 = arith.cmpi sgt, %2, %7 : vector<1x512xi32>
    %c15_i32_1 = arith.constant 15 : i32
    %9 = vector.broadcast %c15_i32_1 : i32 to vector<1x512xi32>
    %10 = arith.cmpi slt, %2, %9 : vector<1x512xi32>
    %c0_i32_2 = arith.constant 0 : i32
    %11 = vector.broadcast %c0_i32_2 : i32 to vector<1x512xi32>
    %12 = arith.cmpi sgt, %6, %11 : vector<1x512xi32>
    %c15_i32_3 = arith.constant 15 : i32
    %13 = vector.broadcast %c15_i32_3 : i32 to vector<1x512xi32>
    %14 = arith.cmpi slt, %6, %13 : vector<1x512xi32>
    %c0 = arith.constant 0 : index
    %c0_4 = arith.constant 0 : index
    %15 = vector.load %arg1[%c0, %c0_4] : memref<8x512xf32, #tpu.memory_space<vmem>>, vector<8x512xf32>
    %c0_5 = arith.constant 0 : index
    %c0_6 = arith.constant 0 : index
    %16 = vector.load %arg7[%c0_5, %c0_6] : memref<8x512xf32, #tpu.memory_space<vmem>>, vector<8x512xf32>
    tpu.vector_store %arg7[%c0_5, %c0_6], %15 {strides = array<i32>} : memref<8x512xf32, #tpu.memory_space<vmem>>, vector<8x512xf32>,
    %c0_7 = arith.constant 0 : index
    %c0_8 = arith.constant 0 : index
    %17 = vector.load %arg7[%c0_7, %c0_8] : memref<8x512xf32, #tpu.memory_space<vmem>>, vector<8x512xf32>
    %18 = vector.extract_strided_slice %17 {offsets = [3, 0], sizes = [1, 512], strides = [1, 1]} : vector<8x512xf32> to vector<1x512xf32>
    %c17_i32 = arith.constant 17 : i32
    %19 = tpu.dynamic_rotate %17 by %c17_i32 dim 1 : vector<8x512xf32>, i32 -> vector<8x512xf32>
    %20 = arith.andi %8, %12 : vector<1x512xi1>
    %cst = arith.constant 0.000000e+00 : f32
    %21 = vector.shape_cast %20 : vector<1x512xi1> to vector<1x512xi1>
    %22 = vector.broadcast %21 : vector<1x512xi1> to vector<8x512xi1>
    %23 = vector.broadcast %cst : f32 to vector<8x512xf32>
    %24 = arith.select %22, %19, %23 : vector<8x512xi1>, vector<8x512xf32>
    %25 = vector.extract_strided_slice %24 {offsets = [3, 0], sizes = [1, 512], strides = [1, 1]} : vector<8x512xf32> to vector<1x512xf32>
    %26 = arith.maximumf %18, %25 : vector<1x512xf32>
    %c0_9 = arith.constant 0 : index
    %c0_10 = arith.constant 0 : index
    %27 = vector.load %arg8[%c0_9, %c0_10] : memref<72x512xf32, #tpu.memory_space<vmem>>, vector<8x512xf32>
    tpu.vector_store %arg8[%c0_9, %c0_10], %24 {strides = array<i32>} : memref<72x512xf32, #tpu.memory_space<vmem>>, vector<8x512xf32>,
    %c16_i32 = arith.constant 16 : i32
    %28 = tpu.dynamic_rotate %17 by %c16_i32 dim 1 : vector<8x512xf32>, i32 -> vector<8x512xf32>
    %cst_11 = arith.constant 0.000000e+00 : f32
    %29 = vector.shape_cast %12 : vector<1x512xi1> to vector<1x512xi1>
    %30 = vector.broadcast %29 : vector<1x512xi1> to vector<8x512xi1>
    %31 = vector.broadcast %cst_11 : f32 to vector<8x512xf32>
    %32 = arith.select %30, %28, %31 : vector<8x512xi1>, vector<8x512xf32>
    %33 = vector.extract_strided_slice %32 {offsets = [3, 0], sizes = [1, 512], strides = [1, 1]} : vector<8x512xf32> to vector<1x512xf32>
    %34 = arith.maximumf %26, %33 : vector<1x512xf32>
    %c8 = arith.constant 8 : index
    %c0_12 = arith.constant 0 : index
    %35 = vector.load %arg8[%c8, %c0_12] : memref<72x512xf32, #tpu.memory_space<vmem>>, vector<8x512xf32>
    tpu.vector_store %arg8[%c8, %c0_12], %32 {strides = array<i32>} : memref<72x512xf32, #tpu.memory_space<vmem>>, vector<8x512xf32>,
    %c15_i32_13 = arith.constant 15 : i32
    %36 = tpu.dynamic_rotate %17 by %c15_i32_13 dim 1 : vector<8x512xf32>, i32 -> vector<8x512xf32>
    %37 = arith.andi %10, %12 : vector<1x512xi1>
    %cst_14 = arith.constant 0.000000e+00 : f32
    %38 = vector.shape_cast %37 : vector<1x512xi1> to vector<1x512xi1>
    %39 = vector.broadcast %38 : vector<1x512xi1> to vector<8x512xi1>
    %40 = vector.broadcast %cst_14 : f32 to vector<8x512xf32>
    %41 = arith.select %39, %36, %40 : vector<8x512xi1>, vector<8x512xf32>
    %42 = vector.extract_strided_slice %41 {offsets = [3, 0], sizes = [1, 512], strides = [1, 1]} : vector<8x512xf32> to vector<1x512xf32>
    %43 = arith.maximumf %34, %42 : vector<1x512xf32>
    %c16 = arith.constant 16 : index
    %c0_15 = arith.constant 0 : index
    %44 = vector.load %arg8[%c16, %c0_15] : memref<72x512xf32, #tpu.memory_space<vmem>>, vector<8x512xf32>
    tpu.vector_store %arg8[%c16, %c0_15], %41 {strides = array<i32>} : memref<72x512xf32, #tpu.memory_space<vmem>>, vector<8x512xf32>,
    %c1_i32 = arith.constant 1 : i32
    %45 = tpu.dynamic_rotate %17 by %c1_i32 dim 1 : vector<8x512xf32>, i32 -> vector<8x512xf32>
    %cst_16 = arith.constant 0.000000e+00 : f32
    %46 = vector.shape_cast %8 : vector<1x512xi1> to vector<1x512xi1>
    %47 = vector.broadcast %46 : vector<1x512xi1> to vector<8x512xi1>
    %48 = vector.broadcast %cst_16 : f32 to vector<8x512xf32>
    %49 = arith.select %47, %45, %48 : vector<8x512xi1>, vector<8x512xf32>
    %50 = vector.extract_strided_slice %49 {offsets = [3, 0], sizes = [1, 512], strides = [1, 1]} : vector<8x512xf32> to vector<1x512xf32>
    %51 = arith.maximumf %43, %50 : vector<1x512xf32>
    %c24 = arith.constant 24 : index
    %c0_17 = arith.constant 0 : index
    %52 = vector.load %arg8[%c24, %c0_17] : memref<72x512xf32, #tpu.memory_space<vmem>>, vector<8x512xf32>
    tpu.vector_store %arg8[%c24, %c0_17], %49 {strides = array<i32>} : memref<72x512xf32, #tpu.memory_space<vmem>>, vector<8x512xf32>,
    %c32 = arith.constant 32 : index
    %c0_18 = arith.constant 0 : index
    %53 = vector.load %arg8[%c32, %c0_18] : memref<72x512xf32, #tpu.memory_space<vmem>>, vector<8x512xf32>
    tpu.vector_store %arg8[%c32, %c0_18], %17 {strides = array<i32>} : memref<72x512xf32, #tpu.memory_space<vmem>>, vector<8x512xf32>,
    %c511_i32 = arith.constant 511 : i32
    %54 = tpu.dynamic_rotate %17 by %c511_i32 dim 1 : vector<8x512xf32>, i32 -> vector<8x512xf32>
    %cst_19 = arith.constant 0.000000e+00 : f32
    %55 = vector.shape_cast %10 : vector<1x512xi1> to vector<1x512xi1>
    %56 = vector.broadcast %55 : vector<1x512xi1> to vector<8x512xi1>
    %57 = vector.broadcast %cst_19 : f32 to vector<8x512xf32>
    %58 = arith.select %56, %54, %57 : vector<8x512xi1>, vector<8x512xf32>
    %59 = vector.extract_strided_slice %58 {offsets = [3, 0], sizes = [1, 512], strides = [1, 1]} : vector<8x512xf32> to vector<1x512xf32>
    %60 = arith.maximumf %51, %59 : vector<1x512xf32>
    %c40 = arith.constant 40 : index
    %c0_20 = arith.constant 0 : index
    %61 = vector.load %arg8[%c40, %c0_20] : memref<72x512xf32, #tpu.memory_space<vmem>>, vector<8x512xf32>
    tpu.vector_store %arg8[%c40, %c0_20], %58 {strides = array<i32>} : memref<72x512xf32, #tpu.memory_space<vmem>>, vector<8x512xf32>,
    %c497_i32 = arith.constant 497 : i32
    %62 = tpu.dynamic_rotate %17 by %c497_i32 dim 1 : vector<8x512xf32>, i32 -> vector<8x512xf32>
    %63 = arith.andi %8, %14 : vector<1x512xi1>
    %cst_21 = arith.constant 0.000000e+00 : f32
    %64 = vector.shape_cast %63 : vector<1x512xi1> to vector<1x512xi1>
    %65 = vector.broadcast %64 : vector<1x512xi1> to vector<8x512xi1>
    %66 = vector.broadcast %cst_21 : f32 to vector<8x512xf32>
    %67 = arith.select %65, %62, %66 : vector<8x512xi1>, vector<8x512xf32>
    %68 = vector.extract_strided_slice %67 {offsets = [3, 0], sizes = [1, 512], strides = [1, 1]} : vector<8x512xf32> to vector<1x512xf32>
    %69 = arith.maximumf %60, %68 : vector<1x512xf32>
    %c48 = arith.constant 48 : index
    %c0_22 = arith.constant 0 : index
    %70 = vector.load %arg8[%c48, %c0_22] : memref<72x512xf32, #tpu.memory_space<vmem>>, vector<8x512xf32>
    tpu.vector_store %arg8[%c48, %c0_22], %67 {strides = array<i32>} : memref<72x512xf32, #tpu.memory_space<vmem>>, vector<8x512xf32>,
    %c496_i32 = arith.constant 496 : i32
    %71 = tpu.dynamic_rotate %17 by %c496_i32 dim 1 : vector<8x512xf32>, i32 -> vector<8x512xf32>
    %cst_23 = arith.constant 0.000000e+00 : f32
    %72 = vector.shape_cast %14 : vector<1x512xi1> to vector<1x512xi1>
    %73 = vector.broadcast %72 : vector<1x512xi1> to vector<8x512xi1>
    %74 = vector.broadcast %cst_23 : f32 to vector<8x512xf32>
    %75 = arith.select %73, %71, %74 : vector<8x512xi1>, vector<8x512xf32>
    %76 = vector.extract_strided_slice %75 {offsets = [3, 0], sizes = [1, 512], strides = [1, 1]} : vector<8x512xf32> to vector<1x512xf32>
    %77 = arith.maximumf %69, %76 : vector<1x512xf32>
    %c56 = arith.constant 56 : index
    %c0_24 = arith.constant 0 : index
    %78 = vector.load %arg8[%c56, %c0_24] : memref<72x512xf32, #tpu.memory_space<vmem>>, vector<8x512xf32>
    tpu.vector_store %arg8[%c56, %c0_24], %75 {strides = array<i32>} : memref<72x512xf32, #tpu.memory_space<vmem>>, vector<8x512xf32>,
    %c495_i32 = arith.constant 495 : i32
    %79 = tpu.dynamic_rotate %17 by %c495_i32 dim 1 : vector<8x512xf32>, i32 -> vector<8x512xf32>
    %80 = arith.andi %10, %14 : vector<1x512xi1>
    %cst_25 = arith.constant 0.000000e+00 : f32
    %81 = vector.shape_cast %80 : vector<1x512xi1> to vector<1x512xi1>
    %82 = vector.broadcast %81 : vector<1x512xi1> to vector<8x512xi1>
    %83 = vector.broadcast %cst_25 : f32 to vector<8x512xf32>
    %84 = arith.select %82, %79, %83 : vector<8x512xi1>, vector<8x512xf32>
    %85 = vector.extract_strided_slice %84 {offsets = [3, 0], sizes = [1, 512], strides = [1, 1]} : vector<8x512xf32> to vector<1x512xf32>
    %86 = arith.maximumf %77, %85 : vector<1x512xf32>
    %c64 = arith.constant 64 : index
    %c0_26 = arith.constant 0 : index
    %87 = vector.load %arg8[%c64, %c0_26] : memref<72x512xf32, #tpu.memory_space<vmem>>, vector<8x512xf32>
    tpu.vector_store %arg8[%c64, %c0_26], %84 {strides = array<i32>} : memref<72x512xf32, #tpu.memory_space<vmem>>, vector<8x512xf32>,
    %cst_27 = arith.constant 1.000000e-01 : f32
    %88 = vector.broadcast %cst_27 : f32 to vector<1x512xf32>
    %89 = arith.cmpf ogt, %86, %88 : vector<1x512xf32>
    %c0_28 = arith.constant 0 : index
    %c0_29 = arith.constant 0 : index
    %90 = vector.load %arg3[%c0_28, %c0_29] : memref<32x72xf32, #tpu.memory_space<vmem>>, vector<32x72xf32>
    %c0_30 = arith.constant 0 : index
    %c0_31 = arith.constant 0 : index
    %91 = vector.load %arg8[%c0_30, %c0_31] : memref<72x512xf32, #tpu.memory_space<vmem>>, vector<72x512xf32>
    %cst_32 = arith.constant dense<0.000000e+00> : vector<32x512xf32>
    %92 = tpu.matmul %90, %91, %cst_32 {dimension_numbers = #tpu.dot_dimension_numbers<[1], [0], [0], [1], [0, 0, 1, 1], [], []>} : vector<32x72xf32>, vector<72x512xf32>, vector<32x512xf32> -> vector<32x512xf32>
    %c0_33 = arith.constant 0 : index
    %c0_34 = arith.constant 0 : index
    %93 = vector.load %arg4[%c0_33, %c0_34] : memref<32x1xf32, #tpu.memory_space<vmem>>, vector<32x1xf32>
    %94 = vector.broadcast %93 : vector<32x1xf32> to vector<32x512xf32>
    %95 = arith.addf %92, %94 : vector<32x512xf32>
    %cst_35 = arith.constant 0.000000e+00 : f32
    %cst_36 = arith.constant 6.000000e+00 : f32
    %96 = vector.broadcast %cst_35 : f32 to vector<32x512xf32>
    %97 = arith.maximumf %96, %95 : vector<32x512xf32>
    %98 = vector.broadcast %cst_36 : f32 to vector<32x512xf32>
    %99 = arith.minimumf %98, %97 : vector<32x512xf32>
    %c0_37 = arith.constant 0 : index
    %c0_38 = arith.constant 0 : index
    %100 = vector.load %arg5[%c0_37, %c0_38] : memref<8x32xf32, #tpu.memory_space<vmem>>, vector<8x32xf32>
    %cst_39 = arith.constant dense<0.000000e+00> : vector<8x512xf32>
    %101 = tpu.matmul %100, %99, %cst_39 {dimension_numbers = #tpu.dot_dimension_numbers<[1], [0], [0], [1], [0, 0, 1, 1], [], []>} : vector<8x32xf32>, vector<32x512xf32>, vector<8x512xf32> -> vector<8x512xf32>
    %c0_40 = arith.constant 0 : index
    %c0_41 = arith.constant 0 : index
    %102 = vector.load %arg6[%c0_40, %c0_41] : memref<8x1xf32, #tpu.memory_space<vmem>>, vector<8x1xf32>
    %103 = vector.broadcast %102 : vector<8x1xf32> to vector<8x512xf32>
    %104 = arith.addf %101, %103 : vector<8x512xf32>
    %c0_42 = arith.constant 0 : index
    %c0_43 = arith.constant 0 : index
    %c0_44 = arith.constant 0 : index
    %105 = vector.load %arg2[%c0_42, %c0_43, %c0_44] : memref<1x1x512xf32, #tpu.memory_space<vmem>>, vector<1x1x512xf32>
    %106 = vector.shape_cast %105 : vector<1x1x512xf32> to vector<1x512xf32>
    %107 = vector.broadcast %106 : vector<1x512xf32> to vector<8x512xf32>
    %108 = arith.mulf %104, %107 : vector<8x512xf32>
    %109 = arith.addf %17, %108 : vector<8x512xf32>
    %110 = vector.extract_strided_slice %109 {offsets = [3, 0], sizes = [1, 512], strides = [1, 1]} : vector<8x512xf32> to vector<1x512xf32>
    %c17_i32_45 = arith.constant 17 : i32
    %111 = tpu.dynamic_rotate %110 by %c17_i32_45 dim 1 : vector<1x512xf32>, i32 -> vector<1x512xf32>
    %112 = arith.andi %8, %12 : vector<1x512xi1>
    %cst_46 = arith.constant 0.000000e+00 : f32
    %113 = vector.broadcast %cst_46 : f32 to vector<1x512xf32>
    %114 = arith.select %112, %111, %113 : vector<1x512xi1>, vector<1x512xf32>
    %115 = arith.maximumf %110, %114 : vector<1x512xf32>
    %c16_i32_47 = arith.constant 16 : i32
    %116 = tpu.dynamic_rotate %110 by %c16_i32_47 dim 1 : vector<1x512xf32>, i32 -> vector<1x512xf32>
    %cst_48 = arith.constant 0.000000e+00 : f32
    %117 = vector.broadcast %cst_48 : f32 to vector<1x512xf32>
    %118 = arith.select %12, %116, %117 : vector<1x512xi1>, vector<1x512xf32>
    %119 = arith.maximumf %115, %118 : vector<1x512xf32>
    %c15_i32_49 = arith.constant 15 : i32
    %120 = tpu.dynamic_rotate %110 by %c15_i32_49 dim 1 : vector<1x512xf32>, i32 -> vector<1x512xf32>
    %121 = arith.andi %10, %12 : vector<1x512xi1>
    %cst_50 = arith.constant 0.000000e+00 : f32
    %122 = vector.broadcast %cst_50 : f32 to vector<1x512xf32>
    %123 = arith.select %121, %120, %122 : vector<1x512xi1>, vector<1x512xf32>
    %124 = arith.maximumf %119, %123 : vector<1x512xf32>
    %c1_i32_51 = arith.constant 1 : i32
    %125 = tpu.dynamic_rotate %110 by %c1_i32_51 dim 1 : vector<1x512xf32>, i32 -> vector<1x512xf32>
    %cst_52 = arith.constant 0.000000e+00 : f32
    %126 = vector.broadcast %cst_52 : f32 to vector<1x512xf32>
    %127 = arith.select %8, %125, %126 : vector<1x512xi1>, vector<1x512xf32>
    %128 = arith.maximumf %124, %127 : vector<1x512xf32>
    %c511_i32_53 = arith.constant 511 : i32
    %129 = tpu.dynamic_rotate %110 by %c511_i32_53 dim 1 : vector<1x512xf32>, i32 -> vector<1x512xf32>
    %cst_54 = arith.constant 0.000000e+00 : f32
    %130 = vector.broadcast %cst_54 : f32 to vector<1x512xf32>
    %131 = arith.select %10, %129, %130 : vector<1x512xi1>, vector<1x512xf32>
    %132 = arith.maximumf %128, %131 : vector<1x512xf32>
    %c497_i32_55 = arith.constant 497 : i32
    %133 = tpu.dynamic_rotate %110 by %c497_i32_55 dim 1 : vector<1x512xf32>, i32 -> vector<1x512xf32>
    %134 = arith.andi %8, %14 : vector<1x512xi1>
    %cst_56 = arith.constant 0.000000e+00 : f32
    %135 = vector.broadcast %cst_56 : f32 to vector<1x512xf32>
    %136 = arith.select %134, %133, %135 : vector<1x512xi1>, vector<1x512xf32>
    %137 = arith.maximumf %132, %136 : vector<1x512xf32>
    %c496_i32_57 = arith.constant 496 : i32
    %138 = tpu.dynamic_rotate %110 by %c496_i32_57 dim 1 : vector<1x512xf32>, i32 -> vector<1x512xf32>
    %cst_58 = arith.constant 0.000000e+00 : f32
    %139 = vector.broadcast %cst_58 : f32 to vector<1x512xf32>
    %140 = arith.select %14, %138, %139 : vector<1x512xi1>, vector<1x512xf32>
    %141 = arith.maximumf %137, %140 : vector<1x512xf32>
    %c495_i32_59 = arith.constant 495 : i32
    %142 = tpu.dynamic_rotate %110 by %c495_i32_59 dim 1 : vector<1x512xf32>, i32 -> vector<1x512xf32>
    %143 = arith.andi %10, %14 : vector<1x512xi1>
    %cst_60 = arith.constant 0.000000e+00 : f32
    %144 = vector.broadcast %cst_60 : f32 to vector<1x512xf32>
    %145 = arith.select %143, %142, %144 : vector<1x512xi1>, vector<1x512xf32>
    %146 = arith.maximumf %141, %145 : vector<1x512xf32>
    %cst_61 = arith.constant 1.000000e-01 : f32
    %147 = vector.broadcast %cst_61 : f32 to vector<1x512xf32>
    %148 = arith.cmpf ogt, %146, %147 : vector<1x512xf32>
    %149 = arith.andi %89, %148 : vector<1x512xi1>
    %cst_62 = arith.constant 0.000000e+00 : f32
    %150 = vector.shape_cast %149 : vector<1x512xi1> to vector<1x512xi1>
    %151 = vector.broadcast %150 : vector<1x512xi1> to vector<8x512xi1>
    %152 = vector.broadcast %cst_62 : f32 to vector<8x512xf32>
    %153 = arith.select %151, %109, %152 : vector<8x512xi1>, vector<8x512xf32>
    %c0_63 = arith.constant 0 : index
    %c0_64 = arith.constant 0 : index
    %154 = vector.load %arg7[%c0_63, %c0_64] : memref<8x512xf32, #tpu.memory_space<vmem>>, vector<8x512xf32>
    tpu.vector_store %arg7[%c0_63, %c0_64], %153 {strides = array<i32>} : memref<8x512xf32, #tpu.memory_space<vmem>>, vector<8x512xf32>,
    return
  }
  func.func @transform_0(%arg0: i32) -> (i32, i32) {
    %c0_i32 = arith.constant 0 : i32
    %c0_i32_0 = arith.constant 0 : i32
    return %c0_i32, %arg0 : i32, i32
  }
  func.func @transform_1(%arg0: i32) -> (i32, i32, i32) {
    %c0_i32 = arith.constant 0 : i32
    %c0_i32_0 = arith.constant 0 : i32
    %c0_i32_1 = arith.constant 0 : i32
    return %c0_i32, %c0_i32_0, %arg0 : i32, i32, i32
  }
  func.func @transform_2(%arg0: i32) -> (i32, i32) {
    %c0_i32 = arith.constant 0 : i32
    %c0_i32_0 = arith.constant 0 : i32
    %c0_i32_1 = arith.constant 0 : i32
    return %c0_i32, %c0_i32_0 : i32, i32
  }
  func.func @transform_3(%arg0: i32) -> (i32, i32) {
    %c0_i32 = arith.constant 0 : i32
    %c0_i32_0 = arith.constant 0 : i32
    %c0_i32_1 = arith.constant 0 : i32
    return %c0_i32, %c0_i32_0 : i32, i32
  }
  func.func @transform_4(%arg0: i32) -> (i32, i32) {
    %c0_i32 = arith.constant 0 : i32
    %c0_i32_0 = arith.constant 0 : i32
    %c0_i32_1 = arith.constant 0 : i32
    return %c0_i32, %c0_i32_0 : i32, i32
  }
  func.func @transform_5(%arg0: i32) -> (i32, i32) {
    %c0_i32 = arith.constant 0 : i32
    %c0_i32_0 = arith.constant 0 : i32
    %c0_i32_1 = arith.constant 0 : i32
    return %c0_i32, %c0_i32_0 : i32, i32
  }
  func.func @transform_6(%arg0: i32) -> (i32, i32) {
    %c0_i32 = arith.constant 0 : i32
    %c0_i32_0 = arith.constant 0 : i32
    return %c0_i32, %arg0 : i32, i32
  }
}

</mosaic_0001>

<bundles_post_ra>
// kernel: tpu_custom_call.1
= control target key start
LH: loop header
LB: loop body
LE: loop exit
PB: predicated region body
PF: predicated region fallthrough
CT: control target
= control target key end

     0   :  { %11 = vsyncpa [#allocation4], 0  ;;  %s2747_s0 = inlined_call_operand.hbm [shape: f32[8,1024], index: 0, kind: input, shape index: {}]   ;;  %s2748_s1 = inlined_call_operand.vmem [shape: f32[1,1,1024], index: 1, kind: input, shape index: {}]   ;;  %s2749_s2 = inlined_call_operand.vmem [shape: f32[32,72], index: 2, kind: input, shape index: {}]   ;;  %s2750_s3 = inlined_call_operand.vmem [shape: f32[32,1], index: 3, kind: input, shape index: {}]   ;;  %s2751_s4 = inlined_call_operand.hbm [shape: f32[8,32], index: 4, kind: input, shape index: {}]   ;;  %s2752_s5 = inlined_call_operand.vmem [shape: f32[8,1], index: 5, kind: input, shape index: {}]   ;;  %s2753_s6 = inlined_call_operand.hbm [shape: f32[8,1024], index: 6, kind: output, shape index: {}]  }
   0x1   :  { %13 = vsyncpa [#allocation4 + $0x1], 0 }
   0x2   :  { %14 = vsyncpa [#allocation7], 0 }
   0x3   :  { %15 = vsyncpa [#allocation5], 0 }
   0x4   :  { %17 = vsyncpa [#allocation5 + $0x1], 0  ;;  %s1692_s21 = smov 0   ;;  %s1694_s22 = smov 0  }
   0x5   :  { %s1696_s23 = smov 0   ;;  %s1698_s24 = smov 0  }
   0x6 LB: > { %s1713_s25 = sadd.s32 4294967295, %s1645_s24   ;;  %s1375_s26 = sadd.s32 4294967294, %s1645_s24   ;;  %s1645_s24 = sphi %s1698_s24, %s2991_s24   ;;  %s1641_s23 = sphi %s1696_s23, %s2990_s23   ;;  %s1637_s22 = sphi %s1694_s22, %s2989_s22   ;;  %s1633_s21 = sphi %s1692_s21, %s2988_s21  }
   0x7   : > { %p43_p0 = scmp.ne.s32.totalorder %s1637_s22, %s1633_s21  ;;  %p44_p1 = scmp.eq.s32.totalorder %s1713_s25, 0 }
   0x8   : > { %p177_p2 = scmp.eq.s32.totalorder %s1713_s25, 1  ;;  %p183_p3 = scmp.eq.s32.totalorder %s1375_s26, 1 }
   0x9   : > { %p1722_p4 = por %p44_p1, %p43_p0  ;;  %p1376_p5 = scmp.ge.s32.totalorder %s1645_s24, 1 }
   0xa   : > { %p1727_p6 = por %p183_p3, %p43_p0  ;;  %p190_p7 = scmp.lt.s32.totalorder %s1645_s24, 3 }
   0xb   : > { %s208_s7 = sshll.u32 %s2751_s4, 4  ;;  %s1647_s9 = smov [#allocation6]   ;;  %s209_s7 = int_to_ptr.hbm [resolvable:$true] %s208_s7 }
   0xc   : > { %p1735_p8 = pnand %p1376_p5, %p190_p7  ;;  %s210_s10 = sshll.u32 %s1647_s9, 4  ;;  %s211_s10 = int_to_ptr.vmem [resolvable:$true] %s210_s10 }
   0xd   : > { %s1745_s11 = sadd.s32 1, %s1645_s24   ;;  %s30_s12 = sadd.s32 1, %s1641_s23 }
   0xe   : > { %p1454_p10 = pneg %p1735_p8  ;;  %s27_s13 = ssub.s32 %s1645_s24, %s1745_s11 }
   0xf   : > { %p28_p12 = scmp.eq.s32.totalorder %s27_s13, 0  ;;  %p37_p13 = scmp.ne.s32.totalorder %s1641_s23, %s1637_s22 }
  0x10   : > { %p1455_p11 = pnand %p1454_p10, %p44_p1  ;;  %p38_p0 = scmp.eq.s32.totalorder %s1645_s24, 0 }
  0x11   : > { %s1754_s14 = scalar_select %p28_p12, %s1641_s23, %s30_s12  }
  0x12   : > { %1457 = dma.hbm_to_vmem [thread:$0]  (!%p1455_p11), %s209_s7, 128, %s211_s10, [#allocation7]  }
  0x13   : > { %p1758_p3 = por %p177_p2, %p37_p13  ;;  %p1467_p5 = scmp.lt.s32.totalorder %s1645_s24, 2 }
  0x14   : > { %s224_s16 = sand.u32 1, %s1641_s23   ;;  %s1412_s17 = sshll.u32 %s1645_s24, 5 }
  0x15   : > { %p39_p7 = por %p38_p0, %p37_p13  ;;  %s1379_s18 = sshll.u32 %s224_s16, 5 }
  0x16   : > { %s233_s26 = scalar_lea.hbm %s2747_s0, %s1412_s17  ;;  %s228_s30 = scalar_lea.vmem [#allocation3], %s1379_s18 }
  0x17   : > { %s235_s29 = sshll.u32 %s233_s26, 4  ;;  %s237_s7 = sshll.u32 %s228_s30, 4  ;;  %s236_s29 = int_to_ptr.hbm [resolvable:$true] %s235_s29  ;;  %s238_s7 = int_to_ptr.vmem [resolvable:$true] %s237_s7 }
  0x18   : > { %p1768_p10 = pnand %p1467_p5, %p39_p7  ;;  %s225_s10 = scalar_lea.sflag [#allocation4], %s224_s16 }
  0x19   : > { %s1545_s12 = sshra.s32 %s236_s29, 4  ;;  %s1552_s18 = scalar_lea.hbm %s2747_s0, 64  ;;  %s1546_s12 = int_to_ptr.hbm [resolvable:$true] %s1545_s12 }
  0x1a   : > { %s1547_s13 = scalar_lea.hbm %s1546_s12, 32  ;;  %p1549_p11 = pneg %p1768_p10 }
  0x1b   : > { %p1548_p2 = scmp.ne.s32.totalorder %s1546_s12, %s1547_s13  ;;  %p1553_p0 = scmp.lt.s32.totalorder %s1546_s12, %s2747_s0 }
  0x1c   : > { %p1554_p5 = scmp.lt.s32.totalorder %s1552_s18, %s1547_s13 }
  0x1d   : > { %p1550_p12 = pnand %p1549_p11, %p1548_p2 }
  0x1e   : > { %p1555_p7 = por %p1554_p5, %p1553_p0 }
  0x1f   : > { %p1551_p13 = pneg %p1550_p12 }
  0x21   : > { %p1556_p9 = pnand %p1555_p7, %p1551_p13 }
  0x23   : > { %1559 = shalt.err (!%p1556_p9)
}
  0x24   : > { %1461 = dma.hbm_to_vmem [thread:$0]  (!%p1768_p10), %s236_s29, 512, %s238_s7, %s225_s10  }
  0x25   : > { %254 = sbr.rel (%p1735_p8) target bundleno = 761 (0x2f9), region = 44 }
  0x2a   : > { %s1785_s16 = sand.u32 1, %s1637_s22  }
  0x2b   : > { %s1383_s30 = sshll.u32 %s1785_s16, 5  ;;  %s257_s17 = scalar_lea.sflag [#allocation4], %s1785_s16 }
  0x2c   : > { %s260_s12 = scalar_lea.vmem [#allocation3], %s1383_s30 }
  0x2d   : > { %1620 = dma.done.wait (%p1722_p4), %s257_s17, 512  }
  0x2e   : > { %1622 = vsyncadd (%p1722_p4), %s257_s17, 4294966784 }
  0x2f   : > { %1624 = dma.done.wait (%p44_p1), [#allocation7], 128  }
  0x30   : > { %1626 = vsyncadd (%p44_p1), [#allocation7], 4294967168  ;;  %v1799_v0 = vld [vmem:[%s260_s12 + $0x18] sm:$0xff]  ;;  %v1801_v1 = vld [vmem:[%s260_s12 + $0x10] sm:$0xff]  ;;  %s1648_s8 = smov 111   ;;  %s1649_s29 = smov 112   ;;  %v306_v5 = vlaneseq }
  0x31   : > { %v1803_v2 = vld [vmem:[%s260_s12] sm:$0xff]  ;;  %604 = vrot.lane.b32.xlu1 %v1799_v0, %s1648_s8  ;;  %569 = vrot.lane.b32.xlu2 %v1801_v1, %s1649_s29  ;;  %s1650_s27 = smov 113   ;;  %s1651_s7 = smov 127   ;;  %v1829_v3 = vld [vmem:[%s260_s12 + $0x8] sm:$0xff]  ;;  %v2810_v14 = vmov 0  ;;  %v2812_v17 = vmov 0 }
  0x32   : > { %598 = vrot.lane.b32.xlu0 %v1803_v2, %s1648_s8  ;;  %s1652_s9 = smov 1   ;;  %s1653_s10 = smov 15   ;;  %v1873_v6 = vand.u32 127, %v306_v5  ;;  %v2815_v22 = vmov 0  ;;  %v2817_v25 = vmov 0  ;;  %v2820_v30 = vmov 0 }
  0x33   : > { %s1654_s13 = smov 16   ;;  %s1655_s19 = smov 17   ;;  %v2822_v31 = vmov 0  ;;  %v2824_v32 = vmov 0  ;;  %v2826_v35 = vmov 0  ;;  %v2828_v51 = vmov 0 }
  0x34   : > { %v310_v7 = vadd.s32 384, %v1873_v6  ;;  %v309_v12 = vadd.s32 256, %v1873_v6  ;;  %vm2763_vm2 = vcmp.lt.s32.totalorder %v1873_v6, 111  ;;  %vm2761_vm7 = vcmp.lt.s32.totalorder %v1873_v6, 112  ;;  %s1386_s17 = sshll.u32 %s1713_s25, 2  ;;  %s1595_s12 = scalar_lea.hbm %s2753_s6, 64 }
  0x35   : > { %vm2758_vm10 = vcmp.lt.s32.totalorder %v1873_v6, 113  ;;  %vm2757_vm13 = vcmp.lt.s32.totalorder %v1873_v6, 127  ;;  %vm2756_vm14 = vcmp.lt.s32.totalorder %v1873_v6, 1  ;;  %v308_v48 = vadd.s32 128, %v1873_v6  ;;  %p301_p1 = scmp.lt.s32.totalorder %s1386_s17, 7 }
  0x36   : > { %v318_v9 = vshra.s32 %v310_v7, 4  ;;  %v314_v10 = vand.u32 15, %v310_v7  ;;  %v317_v15 = vshra.s32 %v309_v12, 4  ;;  %v313_v19 = vand.u32 15, %v309_v12 }
  0x37   : > { %v315_v50 = vshra.s32 %v1873_v6, 4  ;;  %v316_v52 = vshra.s32 %v308_v48, 4  ;;  %v2830_v54 = vmov 0  ;;  %v311_v58 = vand.u32 15, %v1873_v6  ;;  %s2993_s17 = smov (!%p301_p1, %s1386_s17), 7 }
  0x38   : > { %v1876_v11 = vand.u32 15, %v318_v9  ;;  %vm1879_vm0 = vcmp.lt.s32.totalorder %v314_v10, 15  ;;  %v1895_v20 = vand.u32 15, %v317_v15  ;;  %vm1905_vm4 = vcmp.lt.s32.totalorder %v313_v19, 15  ;;  %s303_s20 = scalar_lea.vmem %s2748_s1, %s2993_s17 }
  0x39   : > { %571 = vrot.lane.b32.xlu2 %v1799_v0, %s1649_s29  ;;  %565 = vrot.lane.b32.xlu1 %v1803_v2, %s1649_s29  ;;  %v2811_v14 = vsel %vm1879_vm0, 4294967295, %v2810_v14  ;;  %v2816_v22 = vsel %vm1905_vm4, 4294967295, %v2815_v22  ;;  %vm1944_vm8 = vcmp.gt.s32.totalorder %v313_v19, 0  ;;  %vm1951_vm9 = vcmp.gt.s32.totalorder %v314_v10, 0 }
  0x3a   : > { %602 = vrot.lane.b32.xlu0 %v1801_v1, %s1648_s8  ;;  %vm2754_vm1 = vcmp.lt.s32.totalorder %v1876_v11, 15  ;;  %vm2755_vm5 = vcmp.lt.s32.totalorder %v1895_v20, 15  ;;  %v2821_v30 = vsel %vm1944_vm8, 4294967295, %v2820_v30  ;;  %v2823_v31 = vsel %vm1951_vm9, 4294967295, %v2822_v31 }
  0x3b   : > { %vm1889_vm3 = vmand %vm1879_vm0, %vm2754_vm1  ;;  %vm2760_vm15 = vcmp.gt.s32.totalorder %v1876_v11, 0  ;;  %v2075_v59 = vand.u32 15, %v315_v50  ;;  %v312_v60 = vand.u32 15, %v308_v48  ;;  %v2080_v61 = vand.u32 15, %v316_v52 }
  0x3c   : > { %v2813_v17 = vsel %vm1889_vm3, 4294967295, %v2812_v17  ;;  %vm1916_vm6 = vmand %vm1905_vm4, %vm2755_vm5  ;;  %v2836_v7 = vmov 0  ;;  %v2839_v9 = vmov 0 }
  0x3d   : > { %2814 = vst [vmem:[#allocation12_spill] sm:$0xff] %v2813_v17  ;;  %v2818_v25 = vsel %vm1916_vm6, 4294967295, %v2817_v25  ;;  %vm1960_vm11 = vmand %vm1944_vm8, %vm2755_vm5 }
  0x3e   : > { %2819 = vst [vmem:[#allocation13_spill] sm:$0xff] %v2818_v25  ;;  %v2825_v32 = vsel %vm1960_vm11, 4294967295, %v2824_v32  ;;  %vm1972_vm12 = vmand %vm1951_vm9, %vm2754_vm1 }
  0x3f   : > { %v2827_v35 = vsel %vm1972_vm12, 4294967295, %v2826_v35 }
  0x41   : > { %534 = vrot.lane.b32.xlu2 %v1799_v0, %s1650_s27  ;;  %532 = vrot.lane.b32.xlu1 %v1801_v1, %s1650_s27 }
  0x42   : > { %528 = vrot.lane.b32.xlu0 %v1803_v2, %s1650_s27 }
  0x49   : > { %501 = vrot.lane.b32.xlu2 %v1799_v0, %s1651_s7  ;;  %499 = vrot.lane.b32.xlu1 %v1801_v1, %s1651_s7 }
  0x4a   : > { %495 = vrot.lane.b32.xlu0 %v1803_v2, %s1651_s7 }
  0x51   : > { %464 = vrot.lane.b32.xlu2 %v1799_v0, %s1652_s9  ;;  %462 = vrot.lane.b32.xlu1 %v1801_v1, %s1652_s9 }
  0x52   : > { %460 = vrot.lane.b32.xlu0 %v1829_v3, %s1652_s9 }
  0x59   : > { %427 = vrot.lane.b32.xlu2 %v1799_v0, %s1653_s10  ;;  %425 = vrot.lane.b32.xlu1 %v1801_v1, %s1653_s10 }
  0x5a   : > { %423 = vrot.lane.b32.xlu0 %v1829_v3, %s1653_s10 }
  0x61   : > { %392 = vrot.lane.b32.xlu2 %v1801_v1, %s1654_s13  ;;  %390 = vrot.lane.b32.xlu1 %v1829_v3, %s1654_s13 }
  0x62   : > { %600 = vrot.lane.b32.xlu0 %v1829_v3, %s1648_s8 }
  0x69   : > { %353 = vrot.lane.b32.xlu2 %v1829_v3, %s1655_s19  ;;  %567 = vrot.lane.b32.xlu1 %v1829_v3, %s1649_s29 }
  0x6a   : > { %394 = vrot.lane.b32.xlu0 %v1799_v0, %s1654_s13 }
  0x71   : > { %530 = vrot.lane.b32.xlu2 %v1829_v3, %s1650_s27  ;;  %357 = vrot.lane.b32.xlu1 %v1799_v0, %s1655_s19 }
  0x72   : > { %355 = vrot.lane.b32.xlu0 %v1801_v1, %s1655_s19 }
  0x79   : > { %421 = vrot.lane.b32.xlu2 %v1803_v2, %s1653_s10  ;;  %458 = vrot.lane.b32.xlu1 %v1803_v2, %s1652_s9 }
  0x7a   : > { %497 = vrot.lane.b32.xlu0 %v1829_v3, %s1651_s7 }
  0x81   : > { %351 = vrot.lane.b32.xlu1 %v1803_v2, %s1655_s19 }
  0x82   : > { %388 = vrot.lane.b32.xlu0 %v1803_v2, %s1654_s13 }
  0x8b   : > { %v1871_v4 = vpop.permute.xlu2 %569 }
  0x93   : > { %v572_v8 = vpop.permute.xlu2 %571 }
  0x94   : > { %v1942_v29 = vsel %vm2761_vm7, %v1871_v4, %v572_v8 }
  0x9b   : > { %v535_v13 = vpop.permute.xlu2 %534 }
  0xa3   : > { %v605_v16 = vpop.permute.xlu1 %604  ;;  %v502_v23 = vpop.permute.xlu2 %501 }
  0xa4   : > { %v1893_v18 = vpop.permute.xlu0 %598 }
  0xa5   : > { %v1900_v21 = vsel %vm2763_vm2, %v605_v16, %v1893_v18 }
  0xa6   : > { %1438 = vmatpush.msk.msra.mxu3 %vm1889_vm3, %v1900_v21 }
  0xab   : > { %v1910_v24 = vpop.permute.xlu1 %565  ;;  %v1964_v33 = vpop.permute.xlu2 %464 }
  0xac   : > { %v1921_v26 = vpop.permute.xlu0 %602  ;;  %v1926_v27 = vsel %vm2761_vm7, %v572_v8, %v1910_v24  ;;  %vm2770_vm7 = vcmp.lt.s32.totalorder %v1873_v6, 16 }
  0xad   : > { %v1931_v28 = vsel %vm2763_vm2, %v1921_v26, %v605_v16  ;;  %1439 = vmatpush.msk.msra.mxu3 %vm2754_vm1, %v1926_v27  ;;  %vm2762_vm1 = vcmp.gt.s32.totalorder %v1895_v20, 0  ;;  %vm2769_vm2 = vcmp.lt.s32.totalorder %v2080_v61, 15 }
  0xae   : > { %1430 = vmatpush.msk.msra.mxu2 %vm1916_vm6, %v1931_v28 }
  0xb0   : > { %1431 = vmatpush.msk.msra.mxu2 %vm2755_vm5, %v1942_v29  ;;  %vm2759_vm5 = vcmp.lt.s32.totalorder %v1873_v6, 15 }
  0xb3   : > { %v1966_v34 = vpop.permute.xlu1 %532  ;;  %v2004_v42 = vpop.permute.xlu2 %427 }
  0xb4   : > { %v1976_v36 = vpop.permute.xlu0 %528  ;;  %v1981_v37 = vsel %vm2758_vm10, %v1966_v34, %v535_v13 }
  0xb5   : > { %v1986_v38 = vsel %vm2758_vm10, %v535_v13, %v1976_v36  ;;  %1432 = vmatpush.msk.msra.mxu2 %vm1960_vm11, %v1981_v37  ;;  %vm2082_vm10 = vcmp.lt.s32.totalorder %v311_v58, 15  ;;  %vm2855_vm11 = vcmp.lt.s32.totalorder %v1873_v6, 16 }
  0xb6   : > { %1440 = vmatpush.msk.msra.mxu3 %vm1972_vm12, %v1986_v38 }
  0xbb   : > { %v1995_v39 = vpop.permute.xlu1 %499  ;;  %v393_v49 = vpop.permute.xlu2 %392 }
  0xbc   : > { %v1997_v40 = vpop.permute.xlu0 %495  ;;  %v2002_v41 = vsel %vm2757_vm13, %v1995_v39, %v502_v23 }
  0xbd   : > { %v2009_v43 = vsel %vm2757_vm13, %v502_v23, %v1997_v40  ;;  %1433 = vmatpush.msk.msra.mxu2 %vm1905_vm4, %v2002_v41  ;;  %vm2055_vm13 = vmand %vm1905_vm4, %vm2762_vm1 }
  0xbe   : > { %1441 = vmatpush.msk.msra.mxu3 %vm1879_vm0, %v2009_v43  ;;  %v2831_v54 = vsel %vm2055_vm13, 4294967295, %v2830_v54 }
  0xbf   : > { %785 = vmatpush.msra.mxu2 %v1801_v1 }
  0xc0   : > { %814 = vmatpush.msra.mxu3 %v1799_v0 }
  0xc3   : > { %v463_v44 = vpop.permute.xlu1 %462  ;;  %v2090_v5 = vpop.permute.xlu2 %353 }
  0xc4   : > { %v2020_v45 = vpop.permute.xlu0 %460  ;;  %v2025_v46 = vsel %vm2756_vm14, %v463_v44, %v1964_v33 }
  0xc5   : > { %v2030_v47 = vsel %vm2756_vm14, %v2020_v45, %v463_v44  ;;  %1442 = vmatpush.msk.msra.mxu3 %vm1951_vm9, %v2025_v46  ;;  %vm2047_vm14 = vmand %vm1879_vm0, %vm2760_vm15  ;;  %vm2766_vm15 = vcmp.lt.s32.totalorder %v2075_v59, 15 }
  0xc6   : > { %1434 = vmatpush.msk.msra.mxu2 %vm1944_vm8, %v2030_v47  ;;  %v2829_v51 = vsel %vm2047_vm14, 4294967295, %v2828_v51  ;;  %vm2098_vm1 = vmand %vm2082_vm10, %vm2766_vm15  ;;  %vm2842_vm15 = vcmp.lt.s32.totalorder %v1873_v6, 111 }
  0xc7   : > { %v2837_v7 = vsel %vm2098_vm1, 4294967295, %v2836_v7  ;;  %vm2844_vm3 = vmmov %vm2842_vm15 }
  0xc8   : > { %2838 = vst [vmem:[#allocation14_spill] sm:$0xff] %v2837_v7 }
  0xcb   : > { %v426_v53 = vpop.permute.xlu1 %425 }
  0xcc   : > { %v2059_v55 = vpop.permute.xlu0 %423  ;;  %v2064_v56 = vsel %vm2759_vm5, %v426_v53, %v2004_v42 }
  0xcd   : > { %v2069_v57 = vsel %vm2759_vm5, %v2059_v55, %v426_v53  ;;  %1443 = vmatpush.msk.msra.mxu3 %vm2047_vm14, %v2064_v56  ;;  %vm2086_vm5 = vcmp.lt.s32.totalorder %v312_v60, 15  ;;  %v2870_v53 = vmov 0 }
  0xce   : > { %1435 = vmatpush.msk.msra.mxu2 %vm2055_vm13, %v2069_v57  ;;  %vm2109_vm6 = vmand %vm2086_vm5, %vm2769_vm2  ;;  %vm2846_vm2 = vcmp.gt.s32.totalorder %v1895_v20, 0 }
  0xcf   : > { %v2840_v9 = vsel %vm2109_vm6, 4294967295, %v2839_v9 }
  0xd0   : > { %2841 = vst [vmem:[#allocation15_spill] sm:$0xff] %v2840_v9 }
  0xd3   : > { %v2103_v8 = vpop.permute.xlu1 %390 }
  0xd4   : > { %v601_v10 = vpop.permute.xlu0 %600  ;;  %v398_v12 = vsel %vm2770_vm7, %v2103_v8, %v393_v49  ;;  %vm2134_vm7 = vcmp.gt.s32.totalorder %v311_v58, 0 }
  0xd5   : > { %v2119_v13 = vsel %vm2842_vm15, %v1893_v18, %v601_v10  ;;  %v2124_v15 = vsel %vm2844_vm3, %v601_v10, %v1921_v26  ;;  %1436 = vmatpush.msk.msra.mxu2 %vm2846_vm2, %v398_v12  ;;  %v531_v18 = vpop.permute.xlu2 %530  ;;  %vm2138_vm15 = vcmp.gt.s32.totalorder %v312_v60, 0  ;;  %vm2851_vm2 = vcmp.lt.s32.totalorder %v1873_v6, 112  ;;  %v2219_v60 = vld [vmem:[%s2749_s2] sm:$0xff] }
  0xd6   : > { %2843 = vst [vmem:[#allocation16_spill] sm:$0xff] %v2119_v13  ;;  %1414 = vmatpush.msk.msra.mxu0 %vm2098_vm1, %v2119_v13  ;;  %1422 = vmatpush.msk.msra.mxu1 %vm2109_vm6, %v2124_v15  ;;  %vm2852_vm3 = vmmov %vm2851_vm2  ;;  %vm2853_vm6 = vcmp.lt.s32.totalorder %v2075_v59, 15  ;;  %vm2854_vm1 = vcmp.lt.s32.totalorder %v2080_v61, 15 }
  0xd7   : > { %2845 = vst [vmem:[#allocation17_spill] sm:$0xff] %v2124_v15 }
  0xdb   : > { %v568_v19 = vpop.permute.xlu1 %567 }
  0xdc   : > { %v2142_v26 = vpop.permute.xlu0 %394  ;;  %v2147_v44 = vsel %vm2851_vm2, %v1910_v24, %v568_v19  ;;  %v2152_v48 = vsel %vm2852_vm3, %v568_v19, %v1871_v4  ;;  %vm2856_vm2 = vmmov %vm2853_vm6  ;;  %v2857_v24 = vmov 0  ;;  %vm2859_vm3 = vcmp.gt.s32.totalorder %v1876_v11, 0 }
  0xdd   : > { %1415 = vmatpush.msk.msra.mxu0 %vm2853_vm6, %v2147_v44  ;;  %1423 = vmatpush.msk.msra.mxu1 %vm2854_vm1, %v2152_v48  ;;  %v397_v50 = vsel %vm2855_vm11, %v393_v49, %v2142_v26  ;;  %vm2167_vm12 = vmand %vm2134_vm7, %vm2856_vm2  ;;  %vm2860_vm6 = vcmp.lt.s32.totalorder %v1873_v6, 113  ;;  %vm2862_vm11 = vcmp.lt.s32.totalorder %v2080_v61, 15 }
  0xde   : > { %v2858_v24 = vsel %vm2167_vm12, 4294967295, %v2857_v24  ;;  %1444 = vmatpush.msk.msra.mxu3 %vm2859_vm3, %v397_v50  ;;  %v2176_v4 = vsel %vm2860_vm6, %v1976_v36, %v531_v18  ;;  %vm2861_vm1 = vmmov %vm2860_vm6  ;;  %vm2786_vm3 = vcmp.lt.s32.totalorder %v1873_v6, 17  ;;  %vm2865_vm6 = vcmp.gt.s32.totalorder %v1895_v20, 0 }
  0xdf   : > { %v2181_v49 = vsel %vm2861_vm1, %v531_v18, %v1966_v34  ;;  %vm2187_vm2 = vmand %vm2138_vm15, %vm2862_vm11  ;;  %1416 = vmatpush.msk.msra.mxu0 %vm2167_vm12, %v2176_v4  ;;  %v2866_v34 = vmov 0  ;;  %vm2869_vm11 = vcmp.gt.s32.totalorder %v1876_v11, 0 }
  0xe0   : > { %1424 = vmatpush.msk.msra.mxu1 %vm2187_vm2, %v2181_v49  ;;  %vm2202_vm1 = vmand %vm1944_vm8, %vm2865_vm6  ;;  %vm2790_vm6 = vcmask 588800  }
  0xe1   : > { %v2867_v34 = vsel %vm2202_vm1, 4294967295, %v2866_v34  ;;  %vm2212_vm12 = vmand %vm1951_vm9, %vm2869_vm11  ;;  %vm2873_vm11 = vcmp.gt.s32.totalorder %v1895_v20, 0 }
  0xe2   : > { %2868 = vst [vmem:[#allocation18_spill] sm:$0xff] %v2867_v34  ;;  %v2871_v53 = vsel %vm2212_vm12, 4294967295, %v2870_v53 }
  0xe3   : > { %v2206_v36 = vpop.permute.xlu1 %357  ;;  %2872 = vst [vmem:[#allocation19_spill] sm:$0xff] %v2871_v53  ;;  %v2800_v53 = vmov 0  }
  0xe4   : > { %v356_v58 = vpop.permute.xlu0 %355  ;;  %1514 = vset.pattern.permute.xlu1 %v2800_v53  ;;  %1513 = vset.pattern.permute.xlu0 %v2800_v53 }
  0xe5   : > { %v361_v10 = vsel %vm2786_vm3, %v2090_v5, %v356_v58  ;;  %v360_v18 = vsel %vm2786_vm3, %v356_v58, %v2206_v36  ;;  %v411_v58 = vsel %vm2873_vm11, %v398_v12, 0.0  ;;  %vm2874_vm3 = vcmp.gt.s32.totalorder %v1876_v11, 0  ;;  %1512 = vset.pattern.permute.xlu2 %v2800_v53 }
  0xe6   : > { %v378_v19 = vsel %vm2202_vm1, %v361_v10, 0.0  ;;  %1437 = vmatpush.msk.msra.mxu2 %vm2202_vm1, %v361_v10  ;;  %v379_v9 = vsel %vm2212_vm12, %v360_v18, 0.0  ;;  %1445 = vmatpush.msk.msra.mxu3 %vm2212_vm12, %v360_v18  ;;  %v412_v10 = vsel %vm2874_vm3, %v397_v50, 0.0  ;;  %v680_v18 = vld [vmem:[%s2750_s3 + $0x8] sm:$0xff]  ;;  %v481_v50 = vsel %vm1944_vm8, %v2030_v47, 0.0 }
  0xe7   : > { %v382_v15 = vmax.f32 %v1801_v1, %v378_v19  ;;  %v383_v7 = vmax.f32 %v1799_v0, %v379_v9  ;;  %1395 = vmatmul.msk.f32.vlgmr.msra.gmra.mxu2 %vm2790_vm6, %v2219_v60  ;;  %1399 = vmatmul.msk.f32.vlgmr.msra.gmra.mxu3 %vm2790_vm6, %v2219_v60  ;;  %v448_v9 = vsel %vm2055_vm13, %v2069_v57, 0.0  ;;  %v449_v19 = vsel %vm2047_vm14, %v2064_v56, 0.0 }
  0xe8   : > { %690 = vperm.xlu1 %1514, %v680_v18   ;;  %v482_v57 = vsel %vm1951_vm9, %v2025_v46, 0.0  ;;  %vm2875_vm11 = vcmp.lt.s32.totalorder %v1873_v6, 127  ;;  %v519_v46 = vsel %vm1879_vm0, %v2009_v43, 0.0  ;;  %v518_v18 = vsel %vm1905_vm4, %v2002_v41, 0.0 }
  0xe9   : > { %v415_v34 = vmax.f32 %v382_v15, %v411_v58  ;;  %v416_v13 = vmax.f32 %v383_v7, %v412_v10  ;;  %v2266_v58 = vld [vmem:[%s2749_s2 + $0x8] sm:$0xff]  ;;  %vm2876_vm6 = vmmov %vm2875_vm11  ;;  %vm2879_vm3 = vnez %v2827_v35  ;;  %vm2880_vm4 = vnez %v2825_v32 }
  0xea   : > { %v556_v41 = vsel %vm2879_vm3, %v1986_v38, 0.0  ;;  %v555_v43 = vsel %vm2880_vm4, %v1981_v37, 0.0  ;;  %vm2881_vm0 = vcmp.gt.s32.totalorder %v2075_v59, 0  ;;  %vm2884_vm3 = vcmp.lt.s32.totalorder %v1873_v6, 1 }
  0xeb   : > { %v452_v12 = vmax.f32 %v415_v34, %v448_v9  ;;  %v453_v15 = vmax.f32 %v416_v13, %v449_v19  ;;  %v459_v7 = vpop.permute.xlu1 %458  ;;  %vm2885_vm4 = vmmov %vm2884_vm3 }
  0xec   : > { %v498_v56 = vpop.permute.xlu0 %497  ;;  %v470_v38 = vsel %vm2884_vm3, %v1964_v33, %v459_v7  ;;  %v469_v37 = vsel %vm2885_vm4, %v459_v7, %v2020_v45  ;;  %vm2886_vm9 = vmmov %vm2881_vm0  ;;  %v682_v33 = vld [vmem:[%s2750_s3 + $0x18] sm:$0xff]  ;;  %vm2890_vm4 = vcmp.lt.s32.totalorder %v1876_v11, 15 }
  0xed   : > { %v485_v13 = vmax.f32 %v452_v12, %v481_v50  ;;  %v486_v34 = vmax.f32 %v453_v15, %v482_v57  ;;  %v2272_v10 = vsel %vm2875_vm11, %v1997_v40, %v498_v56  ;;  %v2277_v47 = vsel %vm2876_vm6, %v498_v56, %v1995_v39  ;;  %v422_v40 = vpop.permute.xlu2 %421  ;;  %vm2322_vm8 = vmand %vm2134_vm7, %vm2886_vm9  ;;  %v681_v15 = vld [vmem:[%s2750_s3 + $0x10] sm:$0xff]  ;;  %700 = vperm.xlu2 %1512, %v682_v33  }
  0xee   : > { %1417 = vmatpush.msk.msra.mxu0 %vm2082_vm10, %v2272_v10  ;;  %1425 = vmatpush.msk.msra.mxu1 %vm2086_vm5, %v2277_v47  ;;  %vm2877_vm6 = vcmask 588800   ;;  %v589_v7 = vsel %vm2890_vm4, %v1926_v27, 0.0  ;;  %vm2891_vm9 = vcmp.lt.s32.totalorder %v1873_v6, 15  ;;  %v865_v27 = vld [vmem:[%s2752_s5] sm:$0xff] }
  0xef   : > { %v522_v9 = vmax.f32 %v485_v13, %v518_v18  ;;  %v523_v39 = vmax.f32 %v486_v34, %v519_v46  ;;  %1396 = vmatmul.msk.f32.gmra.mxu2 %vm2877_vm6, %v2266_v58  ;;  %vm2878_vm11 = vmmov %vm2877_vm6  ;;  %v433_v56 = vsel %vm2891_vm9, %v2004_v42, %v422_v40  ;;  %695 = vperm.xlu0 %1513, %v681_v15  }
  0xf0   : > { %1400 = vmatmul.msk.f32.gmra.mxu3 %vm2878_vm11, %v2266_v58  ;;  %727 = vmatpush.msra.mxu0 %v1803_v2  ;;  %vm2307_vm6 = vmand %vm2082_vm10, %vm2881_vm0  ;;  %vm2795_vm11 = vcmp.gt.s32.totalorder %v2080_v61, 0  ;;  %vm2889_vm0 = vcmp.lt.s32.totalorder %v1895_v20, 15 }
  0xf1   : > { %756 = vmatpush.msra.mxu1 %v1829_v3  ;;  %v559_v50 = vmax.f32 %v522_v9, %v555_v43  ;;  %v560_v57 = vmax.f32 %v523_v39, %v556_v41  ;;  %v588_v45 = vsel %vm2889_vm0, %v1942_v29, 0.0  ;;  %vm2349_vm3 = vmand %vm2138_vm15, %vm2795_vm11  ;;  %868 = vperm.xlu1 %1514, %v865_v27   ;;  %v679_v27 = vld [vmem:[%s2750_s3] sm:$0xff] }
  0xf2   : > { %1418 = vmatpush.msk.msra.mxu0 %vm2134_vm7, %v470_v38  ;;  %vm2894_vm0 = vmmov %vm2891_vm9  ;;  %vm2897_vm9 = vcmp.lt.s32.totalorder %v1873_v6, 17 }
  0xf3   : > { %1426 = vmatpush.msk.msra.mxu1 %vm2138_vm15, %v469_v37  ;;  %v352_v13 = vpop.permute.xlu1 %351  ;;  %v432_v34 = vsel %vm2894_vm0, %v422_v40, %v2059_v55  ;;  %vm2363_vm4 = vmand %vm2086_vm5, %vm2795_vm11  ;;  %v592_v46 = vmax.f32 %v559_v50, %v588_v45  ;;  %v593_v18 = vmax.f32 %v560_v57, %v589_v7  ;;  %v641_v55 = vld [vmem:[%s2749_s2 + $0x10] sm:$0xff]  ;;  %vm2899_vm11 = vcmp.lt.s32.totalorder %v1873_v6, 16 }
  0xf4   : > { %1419 = vmatpush.msk.msra.mxu0 %vm2307_vm6, %v433_v56  ;;  %v389_v9 = vpop.permute.xlu0 %388  ;;  %v363_v40 = vsel %vm2897_vm9, %v2206_v36, %v352_v13  ;;  %vm2898_vm0 = vmmov %vm2897_vm9  ;;  %vm2901_vm9 = vnez %v2813_v17 }
  0xf5   : > { %1427 = vmatpush.msk.msra.mxu1 %vm2363_vm4, %v432_v34  ;;  %v362_v39 = vsel %vm2898_vm0, %v352_v13, %v2090_v5  ;;  %v400_v41 = vsel %vm2899_vm11, %v2142_v26, %v389_v9  ;;  %vm2900_vm14 = vmmov %vm2899_vm11  ;;  %v376_v15 = vsel %vm2322_vm8, %v363_v40, 0.0  ;;  %v626_v36 = vsel %vm2901_vm9, %v1900_v21, 0.0  ;;  %685 = vperm.xlu2 %1512, %v679_v27  }
  0xf6   : > { %v399_v43 = vsel %vm2900_vm14, %v389_v9, %v2103_v8  ;;  %v377_v33 = vsel %vm2349_vm3, %v362_v39, 0.0  ;;  %vm2902_vm0 = vnez %v2818_v25  ;;  %vm2903_vm11 = vcmp.gt.s32.totalorder %v2075_v59, 0 }
  0xf7   : > { %v625_v5 = vsel %vm2902_vm0, %v1931_v28, 0.0  ;;  %1420 = vmatpush.msk.msra.mxu0 %vm2903_vm11, %v400_v41  ;;  %vm2904_vm14 = vcmp.gt.s32.totalorder %v2080_v61, 0  ;;  %v380_v8 = vmax.f32 %v1803_v2, %v376_v15  ;;  %v381_v26 = vmax.f32 %v1829_v3, %v377_v33  ;;  %vm2905_vm13 = vmmov %vm2903_vm11 }
  0xf8   : > { %1428 = vmatpush.msk.msra.mxu1 %vm2904_vm14, %v399_v43  ;;  %v409_v50 = vsel %vm2905_vm13, %v400_v41, 0.0  ;;  %vm2906_vm12 = vmmov %vm2904_vm14  ;;  %vm2907_vm9 = vcmask 588800   ;;  %v2408_v28 = vmax.f32 %v592_v46, %v625_v5  ;;  %v2410_v57 = vmax.f32 %v593_v18, %v626_v36 }
  0xf9   : > { %v410_v21 = vsel %vm2906_vm12, %v399_v43, 0.0  ;;  %1397 = vmatmul.msk.f32.gmra.mxu2 %vm2907_vm9, %v641_v55  ;;  %vm2908_vm1 = vmmov %vm2907_vm9  ;;  %v413_v45 = vmax.f32 %v380_v8, %v409_v50  ;;  %1421 = vmatpush.msk.msra.mxu0 %vm2322_vm8, %v363_v40  ;;  %v446_v13 = vsel %vm2307_vm6, %v433_v56, 0.0  ;;  %v447_v46 = vsel %vm2363_vm4, %v432_v34, 0.0  ;;  %v642_v34 = vld [vmem:[%s2749_s2 + $0x18] sm:$0xff]  ;;  %v2919_v8 = vld [vmem:[#allocation16_spill] sm:$0xff] }
  0xfa   : > { %1401 = vmatmul.msk.f32.gmra.mxu3 %vm2908_vm1, %v641_v55  ;;  %2909 = vst [vmem:[#allocation20_spill] sm:$0xff] %v2408_v28  ;;  %v414_v7 = vmax.f32 %v381_v26, %v410_v21  ;;  %1429 = vmatpush.msk.msra.mxu1 %vm2349_vm3, %v362_v39  ;;  %vm2911_vm12 = vmmov %vm2908_vm1  ;;  %v479_v40 = vsel %vm2134_vm7, %v470_v38, 0.0  ;;  %v480_v39 = vsel %vm2138_vm15, %v469_v37, 0.0  ;;  %v516_v43 = vsel %vm2082_vm10, %v2272_v10, 0.0  ;;  %v2920_v26 = vld [vmem:[#allocation14_spill] sm:$0xff]  ;;  %v2922_v21 = vld [vmem:[#allocation17_spill] sm:$0xff] }
  0xfb   : > { %2910 = vst [vmem:[#allocation21_spill] sm:$0xff] %v2410_v57  ;;  %1387 = vmatmul.msk.f32.vlgmr.msra.gmra.mxu0 %vm2911_vm12, %v2219_v60  ;;  %vm2912_vm13 = vmmov %vm2908_vm1  ;;  %v450_v18 = vmax.f32 %v413_v45, %v446_v13  ;;  %vm2913_vm1 = vnez %v2858_v24  ;;  %v554_v33 = vsel %vm2187_vm2, %v2181_v49, 0.0  ;;  %vm2915_vm14 = vcmp.lt.s32.totalorder %v2075_v59, 15  ;;  %v2923_v45 = vld [vmem:[#allocation15_spill] sm:$0xff] }
  0xfc   : > { %1391 = vmatmul.msk.f32.vlgmr.msra.gmra.mxu1 %vm2912_vm13, %v2219_v60  ;;  %v451_v9 = vmax.f32 %v414_v7, %v447_v46  ;;  %v517_v60 = vsel %vm2086_vm5, %v2277_v47, 0.0  ;;  %v553_v37 = vsel %vm2913_vm1, %v2176_v4, 0.0  ;;  %vm2914_vm11 = vmmov %vm2907_vm9  ;;  %v586_v47 = vsel %vm2915_vm14, %v2147_v44, 0.0 }
  0xfd   : > { %v483_v41 = vmax.f32 %v450_v18, %v479_v40  ;;  %vm2916_vm12 = vcmp.lt.s32.totalorder %v2080_v61, 15  ;;  %vm2917_vm13 = vmmov %vm2907_vm9 }
  0xfe   : > { %v484_v56 = vmax.f32 %v451_v9, %v480_v39  ;;  %v587_v5 = vsel %vm2916_vm12, %v2152_v48, 0.0  ;;  %vm2918_vm0 = vmmov %vm2907_vm9 }
  0xff   : > { %v520_v15 = vmax.f32 %v483_v41, %v516_v43  ;;  %vm2926_vm14 = vmmov %vm2918_vm0 }
 0x100   : > { %v521_v38 = vmax.f32 %v484_v56, %v517_v60  ;;  %vm2927_vm12 = vmmov %vm2918_vm0 }
 0x101   : > { %1398 = vmatmul.msk.f32.gmra.mxu2 %vm2907_vm9, %v642_v34  ;;  %v557_v10 = vmax.f32 %v520_v15, %v553_v37  ;;  %vm2921_vm9 = vnez %v2920_v26 }
 0x102   : > { %1402 = vmatmul.msk.f32.gmra.mxu3 %vm2914_vm11, %v642_v34  ;;  %v558_v36 = vmax.f32 %v521_v38, %v554_v33  ;;  %v623_v50 = vsel %vm2921_vm9, %v2919_v8, 0.0  ;;  %vm2924_vm11 = vnez %v2923_v45  ;;  %v2978_v45 = vmov 0  }
 0x103   : > { %1388 = vmatmul.msk.f32.gmra.mxu0 %vm2917_vm13, %v2266_v58  ;;  %v590_v4 = vmax.f32 %v557_v10, %v586_v47  ;;  %v624_v44 = vsel %vm2924_vm11, %v2922_v21, 0.0  ;;  %vm2928_vm13 = vmmov %vm2918_vm0 }
 0x104   : > { %1392 = vmatmul.msk.f32.gmra.mxu1 %vm2918_vm0, %v2266_v58  ;;  %v591_v49 = vmax.f32 %v558_v36, %v587_v5 }
 0x105   : > { %v2464_v7 = vmax.f32 %v590_v4, %v623_v50 }
 0x106   : > { %v2466_v27 = vmax.f32 %v591_v49, %v624_v44 }
 0x108   : > { %2925 = vst [vmem:[#allocation16_spill] sm:$0xff] %v2466_v27 }
 0x10b   : > { %1389 = vmatmul.msk.f32.gmra.mxu0 %vm2926_vm14, %v641_v55  ;;  %vm871_vm14 = vcmask 261120  }
 0x10c   : > { %1393 = vmatmul.msk.f32.gmra.mxu1 %vm2927_vm12, %v641_v55  ;;  %vm2929_vm12 = vcmp.lt.s32.totalorder %v1873_v6, 17 }
 0x113   : > { %1390 = vmatmul.msk.f32.gmra.mxu0 %vm2928_vm13, %v642_v34  ;;  %vm2930_vm13 = vcmp.lt.s32.totalorder %v1873_v6, 16 }
 0x114   : > { %1394 = vmatmul.msk.f32.gmra.mxu1 %vm2918_vm0, %v642_v34  ;;  %vm2931_vm0 = vcmp.gt.s32.totalorder %v2080_v61, 0 }
 0x147   : > { %v701_v40 = vpop.permute.xlu2 %700 }
 0x14f   : > { %v686_v55 = vpop.permute.xlu2 %685 }
 0x15a   : > { %v691_v37 = vpop.permute.xlu1 %690 }
 0x161   : > { %v696_v56 = vpop.permute.xlu0 %695 }
 0x16a   : > { %v791_v48 = vpop.f32.mrf.mxu2  ;;  %v820_v58 = vpop.f32.mrf.mxu3 }
 0x16b   : > { %v792_v47 = vadd.f32 %v791_v48, %v686_v55  ;;  %v821_v5 = vadd.f32 %v820_v58, %v686_v55 }
 0x172   : > { %v794_v13 = vpop.f32.mrf.mxu2 }
 0x173   : > { %v823_v46 = vpop.f32.mrf.mxu3  ;;  %v795_v33 = vadd.f32 %v794_v13, %v691_v37 }
 0x174   : > { %v824_v36 = vadd.f32 %v823_v46, %v691_v37 }
 0x175   : > { %v838_v53 = vmax.f32 %v795_v33, 0.0  ;;  %v864_v33 = vld [vmem:[#allocation6] sm:$0xff] }
 0x176   : > { %v839_v57 = vmax.f32 %v824_v36, 0.0 }
 0x177   : > { %v854_v48 = vmin.f32 %v838_v53, 6.0 }
 0x178   : > { %v733_v18 = vpop.f32.mrf.mxu0  ;;  %v855_v58 = vmin.f32 %v839_v57, 6.0 }
 0x179   : > { %v762_v9 = vpop.f32.mrf.mxu1 }
 0x17a   : > { %v763_v53 = vadd.f32 %v762_v9, %v686_v55 }
 0x17c   : > { %v797_v39 = vpop.f32.mrf.mxu2 }
 0x17d   : > { %v826_v41 = vpop.f32.mrf.mxu3  ;;  %v798_v15 = vadd.f32 %v797_v39, %v696_v56  ;;  %v834_v39 = vmax.f32 %v792_v47, 0.0 }
 0x17e   : > { %v827_v38 = vadd.f32 %v826_v41, %v696_v56  ;;  %v835_v41 = vmax.f32 %v821_v5, 0.0 }
 0x17f   : > { %v842_v8 = vmax.f32 %v798_v15, 0.0  ;;  %v850_v15 = vmin.f32 %v834_v39, 6.0 }
 0x180   : > { %v736_v43 = vpop.f32.mrf.mxu0  ;;  %v843_v50 = vmax.f32 %v827_v38, 0.0  ;;  %v851_v38 = vmin.f32 %v835_v41, 6.0  ;;  %v955_v41 = vld [vmem:[%s303_s20] sm:$0xf] }
 0x181   : > { %v765_v60 = vpop.f32.mrf.mxu1  ;;  %v858_v13 = vmin.f32 %v842_v8, 6.0  ;;  %v737_v36 = vadd.f32 %v736_v43, %v691_v37 }
 0x182   : > { %v859_v46 = vmin.f32 %v843_v50, 6.0 }
 0x184   : > { %v800_v10 = vpop.f32.mrf.mxu2 }
 0x185   : > { %v829_v34 = vpop.f32.mrf.mxu3  ;;  %v801_v4 = vadd.f32 %v800_v10, %v701_v40 }
 0x186   : > { %v830_v49 = vadd.f32 %v829_v34, %v701_v40 }
 0x187   : > { %v846_v21 = vmax.f32 %v801_v4, 0.0  ;;  %v766_v4 = vadd.f32 %v765_v60, %v691_v37  ;;  %v833_v60 = vmax.f32 %v763_v53, 0.0 }
 0x188   : > { %v847_v44 = vmax.f32 %v830_v49, 0.0  ;;  %v739_v28 = vpop.f32.mrf.mxu0 }
 0x189   : > { %v768_v17 = vpop.f32.mrf.mxu1  ;;  %v862_v25 = vmin.f32 %v846_v21, 6.0  ;;  %v740_v10 = vadd.f32 %v739_v28, %v696_v56  ;;  %v837_v50 = vmax.f32 %v766_v4, 0.0  ;;  %v849_v39 = vmin.f32 %v833_v60, 6.0 }
 0x18a   : > { %v863_v27 = vmin.f32 %v847_v44, 6.0  ;;  %v769_v34 = vadd.f32 %v768_v17, %v696_v56  ;;  %v836_v56 = vmax.f32 %v737_v36, 0.0 }
 0x18b   : > { %927 = vmatpush.msrb.mxu2 %v862_v25  ;;  %v734_v25 = vadd.f32 %v733_v18, %v686_v55  ;;  %v840_v28 = vmax.f32 %v740_v10, 0.0  ;;  %v853_v37 = vmin.f32 %v837_v50, 6.0 }
 0x18c   : > { %947 = vmatpush.msrb.mxu3 %v863_v27  ;;  %v841_v17 = vmax.f32 %v769_v34, 0.0  ;;  %v852_v9 = vmin.f32 %v836_v56, 6.0 }
 0x18d   : > { %928 = vmatpush.msrb.mxu2 %v858_v13  ;;  %v832_v44 = vmax.f32 %v734_v25, 0.0  ;;  %v869_v13 = vpop.permute.xlu1 %868 }
 0x18e   : > { %948 = vmatpush.msrb.mxu3 %v859_v46  ;;  %v857_v18 = vmin.f32 %v841_v17, 6.0  ;;  %v957_v46 = vperm.slane %v955_v41, 0  ;;  %v960_v17 = vperm.slane %v955_v41, 3 }
 0x18f   : > { %929 = vmatpush.msrb.mxu2 %v854_v48  ;;  %v848_v55 = vmin.f32 %v832_v44, 6.0  ;;  %v958_v48 = vperm.slane %v955_v41, 1 }
 0x190   : > { %949 = vmatpush.msrb.mxu3 %v855_v58  ;;  %v742_v47 = vpop.f32.mrf.mxu0 }
 0x191   : > { %v771_v5 = vpop.f32.mrf.mxu1  ;;  %v743_v49 = vadd.f32 %v742_v47, %v701_v40  ;;  %930 = vmatpush.msrb.mxu2 %v850_v15 }
 0x192   : > { %v772_v8 = vadd.f32 %v771_v5, %v701_v40  ;;  %950 = vmatpush.msrb.mxu3 %v851_v38  ;;  %1405 = vmatmul.msk.f32.vlgmr.msrb.gmra.mxu2 %vm871_vm14, %v864_v33  ;;  %v856_v40 = vmin.f32 %v840_v28, 6.0 }
 0x193   : > { %1406 = vmatmul.msk.f32.vlgmr.msrb.gmra.mxu3 %vm871_vm14, %v864_v33  ;;  %v844_v57 = vmax.f32 %v743_v49, 0.0  ;;  %v959_v49 = vperm.slane %v955_v41, 2 }
 0x194   : > { %v845_v27 = vmax.f32 %v772_v8, 0.0 }
 0x195   : > { %v860_v43 = vmin.f32 %v844_v57, 6.0 }
 0x196   : > { %v861_v21 = vmin.f32 %v845_v27, 6.0 }
 0x197   : > { %887 = vmatpush.msrb.mxu0 %v860_v43 }
 0x198   : > { %907 = vmatpush.msrb.mxu1 %v861_v21 }
 0x199   : > { %888 = vmatpush.msrb.mxu0 %v856_v40 }
 0x19a   : > { %908 = vmatpush.msrb.mxu1 %v857_v18 }
 0x19b   : > { %889 = vmatpush.msrb.mxu0 %v852_v9 }
 0x19c   : > { %909 = vmatpush.msrb.mxu1 %v853_v37 }
 0x19d   : > { %890 = vmatpush.msrb.mxu0 %v848_v55 }
 0x19e   : > { %910 = vmatpush.msrb.mxu1 %v849_v39  ;;  %1403 = vmatmul.msk.f32.vlgmr.msrb.gmra.mxu0 %vm871_vm14, %v864_v33 }
 0x19f   : > { %1404 = vmatmul.msk.f32.vlgmr.msrb.gmra.mxu1 %vm871_vm14, %v864_v33  ;;  %vm2933_vm14 = vmmov %vm2929_vm12 }
 0x216   : > { %v952_v25 = vpop.f32.mrf.mxu3 }
 0x217   : > { %v953_v28 = vadd.f32 %v952_v25, %v869_v13 }
 0x219   : > { %v968_v27 = vmul.f32 %v960_v17, %v953_v28 }
 0x21b   : > { %v892_v58 = vpop.f32.mrf.mxu0  ;;  %v2508_v56 = vadd.f32 %v968_v27, %v1799_v0 }
 0x21c   : > { %v912_v15 = vpop.f32.mrf.mxu1  ;;  %v893_v38 = vadd.f32 %v892_v58, %v869_v13 }
 0x21d   : > { %v913_v10 = vadd.f32 %v912_v15, %v869_v13  ;;  %v980_v50 = vrot.slane %v2508_v56, 3 }
 0x21e   : > { %v965_v34 = vmul.f32 %v957_v46, %v893_v38 }
 0x21f   : > { %v966_v36 = vmul.f32 %v958_v48, %v913_v10 }
 0x220   : > { %v2481_v47 = vadd.f32 %v965_v34, %v1803_v2  ;;  %v932_v2 = vpop.f32.mrf.mxu2 }
 0x221   : > { %v2484_v33 = vadd.f32 %v966_v36, %v1829_v3  ;;  %v933_v3 = vadd.f32 %v932_v2, %v869_v13 }
 0x222   : > { %v977_v5 = vrot.slane %v2481_v47, 3 }
 0x223   : > { %v978_v4 = vrot.slane %v2484_v33, 3  ;;  %v967_v8 = vmul.f32 %v959_v49, %v933_v3 }
 0x224   : > { %985 = vrot.lane.b32.xlu2 %v977_v5, %s1655_s19 }
 0x225   : > { %1019 = vrot.lane.b32.xlu1 %v978_v4, %s1654_s13  ;;  %987 = vrot.lane.b32.xlu0 %v978_v4, %s1655_s19  ;;  %v2501_v53 = vadd.f32 %v967_v8, %v1801_v1  ;;  %v2935_v8 = vld [vmem:[#allocation18_spill] sm:$0xff] }
 0x227   : > { %v979_v57 = vrot.slane %v2501_v53, 3 }
 0x22c   : > { %1051 = vrot.lane.b32.xlu2 %v978_v4, %s1653_s10 }
 0x22d   : > { %1049 = vrot.lane.b32.xlu1 %v977_v5, %s1653_s10  ;;  %1017 = vrot.lane.b32.xlu0 %v977_v5, %s1654_s13 }
 0x234   : > { %1081 = vrot.lane.b32.xlu2 %v977_v5, %s1652_s9 }
 0x235   : > { %1115 = vrot.lane.b32.xlu1 %v978_v4, %s1651_s7  ;;  %1083 = vrot.lane.b32.xlu0 %v978_v4, %s1652_s9 }
 0x23c   : > { %1147 = vrot.lane.b32.xlu2 %v978_v4, %s1650_s27 }
 0x23d   : > { %1145 = vrot.lane.b32.xlu1 %v977_v5, %s1650_s27  ;;  %1113 = vrot.lane.b32.xlu0 %v977_v5, %s1651_s7 }
 0x244   : > { %1177 = vrot.lane.b32.xlu2 %v977_v5, %s1649_s29 }
 0x245   : > { %989 = vrot.lane.b32.xlu1 %v979_v57, %s1655_s19  ;;  %1179 = vrot.lane.b32.xlu0 %v978_v4, %s1649_s29 }
 0x24c   : > { %991 = vrot.lane.b32.xlu2 %v980_v50, %s1655_s19 }
 0x24d   : > { %1055 = vrot.lane.b32.xlu1 %v980_v50, %s1653_s10  ;;  %1209 = vrot.lane.b32.xlu0 %v977_v5, %s1648_s8 }
 0x254   : > { %1021 = vrot.lane.b32.xlu2 %v979_v57, %s1654_s13 }
 0x255   : > { %1085 = vrot.lane.b32.xlu1 %v979_v57, %s1652_s9  ;;  %1023 = vrot.lane.b32.xlu0 %v980_v50, %s1654_s13 }
 0x25c   : > { %1087 = vrot.lane.b32.xlu2 %v980_v50, %s1652_s9 }
 0x25d   : > { %1151 = vrot.lane.b32.xlu1 %v980_v50, %s1650_s27  ;;  %1053 = vrot.lane.b32.xlu0 %v979_v57, %s1653_s10  ;;  %s1270_s10 = scalar_lea.sflag [#allocation5], %s1785_s16 }
 0x264   : > { %1117 = vrot.lane.b32.xlu2 %v979_v57, %s1651_s7 }
 0x265   : > { %1181 = vrot.lane.b32.xlu1 %v979_v57, %s1649_s29  ;;  %1119 = vrot.lane.b32.xlu0 %v980_v50, %s1651_s7 }
 0x26c   : > { %1183 = vrot.lane.b32.xlu2 %v980_v50, %s1649_s29  ;;  %s298_s29 = scalar_lea.vmem [#allocation8], %s1383_s30 }
 0x26d   : > { %1211 = vrot.lane.b32.xlu1 %v978_v4, %s1648_s8  ;;  %1149 = vrot.lane.b32.xlu0 %v979_v57, %s1650_s27 }
 0x274   : > { %1213 = vrot.lane.b32.xlu2 %v979_v57, %s1648_s8 }
 0x275   : > { %1215 = vrot.lane.b32.xlu0 %v980_v50, %s1648_s8  ;;  %s1413_s8 = sshll.u32 %s1713_s25, 5  ;;  %s1283_s25 = sshll.u32 %s298_s29, 4  ;;  %s1284_s25 = int_to_ptr.vmem [resolvable:$true] %s1283_s25 }
 0x276   : > { %s1281_s9 = scalar_lea.hbm %s2753_s6, %s1413_s8 }
 0x277   : > { %s1285_s30 = sshll.u32 %s1281_s9, 4  ;;  %s1286_s30 = int_to_ptr.hbm [resolvable:$true] %s1285_s30 }
 0x278   : > { %s1589_s13 = sshra.s32 %s1286_s30, 4  ;;  %s1590_s13 = int_to_ptr.hbm [resolvable:$true] %s1589_s13 }
 0x279   : > { %s1591_s19 = scalar_lea.hbm %s1590_s13, 32  ;;  %p1596_p10 = scmp.lt.s32.totalorder %s1590_s13, %s2753_s6 }
 0x27a   : > { %p1592_p4 = scmp.ne.s32.totalorder %s1590_s13, %s1591_s19  ;;  %p1597_p2 = scmp.lt.s32.totalorder %s1595_s12, %s1591_s19 }
 0x27c   : > { %p1593_p8 = pnand %p1592_p4, %p1758_p3  ;;  %p1598_p11 = por %p1597_p2, %p1596_p10 }
 0x27e   : > { %v986_v0 = vpop.permute.xlu2 %985  ;;  %p1594_p9 = pneg %p1593_p8 }
 0x280   : > { %p1599_p12 = pnand %p1598_p11, %p1594_p9 }
 0x286   : > { %v1052_v1 = vpop.permute.xlu2 %1051 }
 0x28e   : > { %v1082_v43 = vpop.permute.xlu2 %1081 }
 0x296   : > { %v2530_v40 = vpop.permute.xlu2 %1147 }
 0x297   : > { %v1020_v21 = vpop.permute.xlu1 %1019  ;;  %v988_v44 = vpop.permute.xlu0 %987 }
 0x298   : > { %v995_v60 = vsel %vm2929_vm12, %v986_v0, %v988_v44  ;;  %vm2934_vm12 = vcmp.gt.s32.totalorder %v1895_v20, 0 }
 0x299   : > { %v998_v18 = vsel %vm2349_vm3, %v995_v60, 0.0  ;;  %vm2932_vm3 = vmmov %vm2930_vm13 }
 0x29a   : > { %v1006_v9 = vrot.slane %v998_v18, 5 }
 0x29c   : > { %v1014_v46 = vmax.f32 %v2484_v33, %v1006_v9 }
 0x29e   : > { %v2536_v41 = vpop.permute.xlu2 %1177 }
 0x29f   : > { %v1050_v37 = vpop.permute.xlu1 %1049  ;;  %v1018_v55 = vpop.permute.xlu0 %1017 }
 0x2a0   : > { %v1027_v39 = vsel %vm2930_vm13, %v1018_v55, %v1020_v21  ;;  %vm2936_vm13 = vnez %v2935_v8 }
 0x2a1   : > { %v1030_v13 = vsel %vm2931_vm0, %v1027_v39, 0.0  ;;  %vm2937_vm0 = vmmov %vm2933_vm14 }
 0x2a2   : > { %v1038_v48 = vrot.slane %v1030_v13, 5 }
 0x2a4   : > { %v2541_v58 = vmax.f32 %v1014_v46, %v1038_v48 }
 0x2a6   : > { %v992_v29 = vpop.permute.xlu2 %991 }
 0x2a7   : > { %v1116_v15 = vpop.permute.xlu1 %1115  ;;  %v2543_v38 = vpop.permute.xlu0 %1083  ;;  %v996_v18 = vsel %vm2937_vm0, %v992_v29, %v986_v0 }
 0x2ae   : > { %v1022_v36 = vpop.permute.xlu2 %1021 }
 0x2af   : > { %v2545_v10 = vpop.permute.xlu1 %1145  ;;  %v2547_v34 = vpop.permute.xlu0 %1113  ;;  %v1026_v5 = vsel %vm2932_vm3, %v1020_v21, %v1022_v36 }
 0x2b0   : > { %v1031_v49 = vsel %vm2934_vm12, %v1026_v5, 0.0  ;;  %vm2939_vm12 = vcmp.lt.s32.totalorder %v1873_v6, 15 }
 0x2b1   : > { %v1039_v17 = vrot.slane %v1031_v49, 5 }
 0x2b6   : > { %v1088_v60 = vpop.permute.xlu2 %1087 }
 0x2b7   : > { %v990_v4 = vpop.permute.xlu1 %989  ;;  %v2551_v2 = vpop.permute.xlu0 %1179 }
 0x2b8   : > { %v994_v3 = vsel %vm2933_vm14, %v988_v44, %v990_v4  ;;  %v997_v44 = vsel %vm2322_vm8, %v996_v18, 0.0  ;;  %vm2938_vm14 = vcmp.gt.s32.totalorder %v2075_v59, 0  ;;  %vm2941_vm8 = vmmov %vm2939_vm12 }
 0x2b9   : > { %v999_v25 = vsel %vm2936_vm13, %v994_v3, 0.0  ;;  %v1005_v13 = vrot.slane %v997_v44, 5  ;;  %vm2940_vm13 = vmmov %vm2937_vm0  ;;  %vm2942_vm0 = vcmp.lt.s32.totalorder %v1873_v6, 1 }
 0x2ba   : > { %v1007_v28 = vrot.slane %v999_v25, 5  ;;  %v993_v12 = vsel %vm2940_vm13, %v990_v4, %v992_v29  ;;  %v1059_v25 = vsel %vm2941_vm8, %v1050_v37, %v1052_v1  ;;  %v2944_v4 = vld [vmem:[#allocation19_spill] sm:$0xff] }
 0x2bb   : > { %v1013_v8 = vmax.f32 %v2481_v47, %v1005_v13  ;;  %v1062_v13 = vsel %vm2363_vm4, %v1059_v25, 0.0  ;;  %vm2952_vm4 = vnez %v2829_v51 }
 0x2bc   : > { %v1015_v57 = vmax.f32 %v2501_v53, %v1007_v28 }
 0x2be   : > { %v2560_v27 = vmax.f32 %v1015_v57, %v1039_v17  ;;  %v1118_v3 = vpop.permute.xlu2 %1117 }
 0x2bf   : > { %v1056_v50 = vpop.permute.xlu1 %1055  ;;  %v2562_v21 = vpop.permute.xlu0 %1209 }
 0x2c0   : > { %v1060_v5 = vsel %vm2939_vm12, %v1056_v50, %v1050_v37  ;;  %vm2945_vm12 = vnez %v2944_v4 }
 0x2c1   : > { %v1061_v0 = vsel %vm2307_vm6, %v1060_v5, 0.0  ;;  %v1000_v19 = vsel %vm2945_vm12, %v993_v12, 0.0  ;;  %vm2946_vm6 = vmmov %vm2941_vm8  ;;  %vm2948_vm8 = vnez %v2831_v54  ;;  %vm2955_vm12 = vcmp.lt.s32.totalorder %v1873_v6, 112 }
 0x2c2   : > { %v1069_v44 = vrot.slane %v1061_v0, 5  ;;  %vm2947_vm13 = vmmov %vm2946_vm6  ;;  %v1008_v16 = vrot.slane %v1000_v19, 5  ;;  %v1070_v0 = vrot.slane %v1062_v13, 5 }
 0x2c4   : > { %v1078_v63 = vmax.f32 %v2541_v58, %v1070_v0 }
 0x2c7   : > { %v1086_v9 = vpop.permute.xlu1 %1085  ;;  %v1024_v39 = vpop.permute.xlu0 %1023 }
 0x2c8   : > { %v1028_v46 = vsel %vm2932_vm3, %v1024_v39, %v1018_v55  ;;  %v1092_v55 = vsel %vm2942_vm0, %v1088_v60, %v1082_v43  ;;  %v1025_v17 = vsel %vm2932_vm3, %v1022_v36, %v1024_v39  ;;  %vm2950_vm3 = vcmp.gt.s32.totalorder %v1876_v11, 0 }
 0x2c9   : > { %v1029_v48 = vsel %vm2938_vm14, %v1028_v46, 0.0  ;;  %vm2943_vm14 = vmmov %vm2942_vm0  ;;  %v1093_v36 = vsel %vm2134_vm7, %v1092_v55, 0.0  ;;  %vm2949_vm0 = vcmp.lt.s32.totalorder %v1873_v6, 127 }
 0x2ca   : > { %v1037_v49 = vrot.slane %v1029_v48, 5  ;;  %v1091_v29 = vsel %vm2943_vm14, %v1082_v43, %v2543_v38  ;;  %v1123_v43 = vsel %vm2949_vm0, %v2547_v34, %v1116_v15  ;;  %v1032_v48 = vsel %vm2950_vm3, %v1025_v17, 0.0  ;;  %vm2951_vm7 = vmmov %vm2949_vm0 }
 0x2cb   : > { %v1094_v42 = vsel %vm2138_vm15, %v1091_v29, 0.0  ;;  %vm2953_vm14 = vcmp.lt.s32.totalorder %v1873_v6, 113  ;;  %v1125_v23 = vsel %vm2082_vm10, %v1123_v43, 0.0  ;;  %v1040_v55 = vrot.slane %v1032_v48, 5 }
 0x2cc   : > { %v1045_v28 = vmax.f32 %v1013_v8, %v1037_v49  ;;  %v1122_v49 = vsel %vm2951_vm7, %v1116_v15, %v1118_v3  ;;  %v1184_v8 = vpop.permute.xlu2 %1183  ;;  %v1155_v25 = vsel %vm2953_vm14, %v2545_v10, %v2530_v40  ;;  %vm2954_vm15 = vcmp.lt.s32.totalorder %v1873_v6, 1  ;;  %vm2963_vm3 = vmmov %vm2953_vm14 }
 0x2cd   : > { %v1126_v15 = vsel %vm2086_vm5, %v1122_v49, 0.0  ;;  %v1090_v51 = vsel %vm2954_vm15, %v2543_v38, %v1086_v9  ;;  %v1133_v38 = vrot.slane %v1125_v23, 5  ;;  %vm2957_vm5 = vmmov %vm2949_vm0  ;;  %vm2958_vm10 = vnez %v2821_v30 }
 0x2ce   : > { %v1134_v13 = vrot.slane %v1126_v15, 5  ;;  %vm2964_vm7 = vmmov %vm2955_vm12 }
 0x2cf   : > { %v2585_v57 = vpop.permute.xlu1 %1151  ;;  %v1054_v18 = vpop.permute.xlu0 %1053  ;;  %vm2966_vm14 = vmmov %vm2964_vm7 }
 0x2d0   : > { %v1058_v37 = vsel %vm2946_vm6, %v1052_v1, %v1054_v18  ;;  %v1057_v39 = vsel %vm2947_vm13, %v1054_v18, %v1056_v50  ;;  %v1077_v1 = vmax.f32 %v1045_v28, %v1069_v44  ;;  %v1101_v50 = vrot.slane %v1093_v36, 5  ;;  %vm2956_vm6 = vmmov %vm2954_vm15 }
 0x2d1   : > { %v1063_v46 = vsel %vm2948_vm8, %v1058_v37, 0.0  ;;  %v1064_v54 = vsel %vm2952_vm4, %v1057_v39, 0.0  ;;  %v1102_v28 = vrot.slane %v1094_v42, 5  ;;  %v1187_v18 = vsel %vm2955_vm12, %v2536_v41, %v2551_v2  ;;  %vm2959_vm13 = vmmov %vm2949_vm0 }
 0x2d2   : > { %v1071_v5 = vrot.slane %v1063_v46, 5  ;;  %v1109_v17 = vmax.f32 %v1077_v1, %v1101_v50  ;;  %v1089_v62 = vsel %vm2956_vm6, %v1086_v9, %v1088_v60  ;;  %v1072_v29 = vrot.slane %v1064_v54, 5  ;;  %vm2968_vm12 = vmmov %vm2964_vm7 }
 0x2d3   : > { %v1157_v44 = vsel %vm2913_vm1, %v1155_v25, 0.0  ;;  %v1095_v36 = vsel %vm2958_vm10, %v1090_v51, 0.0  ;;  %vm2960_vm8 = vcmp.lt.s32.totalorder %v2075_v59, 15  ;;  %vm2961_vm0 = vnez %v2823_v31 }
 0x2d4   : > { %v1079_v12 = vmax.f32 %v2560_v27, %v1071_v5  ;;  %v1016_v27 = vmax.f32 %v2508_v56, %v1008_v16  ;;  %v1189_v9 = vsel %vm2960_vm8, %v1187_v18, 0.0  ;;  %v1096_v24 = vsel %vm2961_vm0, %v1089_v62, 0.0  ;;  %v1214_v49 = vpop.permute.xlu2 %1213  ;;  %vm2973_vm8 = vmmov %vm2963_vm3 }
 0x2d5   : > { %vm2962_vm1 = vnez %v2811_v14  ;;  %v1141_v46 = vmax.f32 %v1109_v17, %v1133_v38  ;;  %v1110_v43 = vmax.f32 %v1078_v63, %v1102_v28  ;;  %v1156_v30 = vsel %vm2963_vm3, %v2585_v57, %v2545_v10 }
 0x2d6   : > { %v1048_v39 = vmax.f32 %v1016_v27, %v1040_v55  ;;  %v1165_v48 = vrot.slane %v1157_v44, 5  ;;  %v1103_v1 = vrot.slane %v1095_v36, 5  ;;  %vm2965_vm4 = vnez %v2816_v22  ;;  %v2977_v36 = vld [vmem:[#allocation16_spill] sm:$0xff] }
 0x2d7   : > { %v1182_v4 = vpop.permute.xlu1 %1181  ;;  %v1120_v19 = vpop.permute.xlu0 %1119  ;;  %v1142_v14 = vmax.f32 %v1110_v43, %v1134_v13  ;;  %v1104_v5 = vrot.slane %v1096_v24, 5  ;;  %v1188_v16 = vsel %vm2966_vm14, %v1184_v8, %v2536_v41  ;;  %vm2967_vm15 = vnez %v2827_v35 }
 0x2d8   : > { %v1124_v37 = vsel %vm2957_vm5, %v1120_v19, %v2547_v34  ;;  %v1121_v60 = vsel %vm2959_vm13, %v1118_v3, %v1120_v19  ;;  %v1080_v34 = vmax.f32 %v1048_v39, %v1072_v29  ;;  %v1186_v59 = vsel %vm2964_vm7, %v2551_v2, %v1182_v4  ;;  %vm2972_vm13 = vmmov %vm2963_vm3 }
 0x2d9   : > { %v1128_v58 = vsel %vm2962_vm1, %v1124_v37, 0.0  ;;  %v1127_v31 = vsel %vm2965_vm4, %v1121_v60, 0.0  ;;  %v1197_v3 = vrot.slane %v1189_v9, 5  ;;  %v1160_v10 = vsel %vm2967_vm15, %v1156_v30, 0.0  ;;  %v2983_v30 = vld [vmem:[#allocation12_spill] sm:$0xff] }
 0x2da   : > { %v1136_v42 = vrot.slane %v1128_v58, 5  ;;  %v1111_v50 = vmax.f32 %v1079_v12, %v1103_v1  ;;  %v1173_v54 = vmax.f32 %v1141_v46, %v1165_v48  ;;  %v1185_v2 = vsel %vm2968_vm12, %v1182_v4, %v1184_v8  ;;  %v2981_v46 = vld [vmem:[#allocation13_spill] sm:$0xff] }
 0x2db   : > { %vm2969_vm6 = vcmp.lt.s32.totalorder %v2080_v61, 15  ;;  %v1112_v0 = vmax.f32 %v1080_v34, %v1104_v5  ;;  %v1135_v25 = vrot.slane %v1127_v31, 5  ;;  %vm2970_vm5 = vcmp.lt.s32.totalorder %v1873_v6, 111  ;;  %v2985_v5 = vld [vmem:[#allocation20_spill] sm:$0xff] }
 0x2dc   : > { %v1190_v22 = vsel %vm2969_vm6, %v1186_v59, 0.0  ;;  %vm2971_vm10 = vmmov %vm2970_vm5  ;;  %vm2974_vm0 = vnez %v2825_v32  ;;  %v1205_v17 = vmax.f32 %v1173_v54, %v1197_v3  ;;  %vm2975_vm1 = vcmp.lt.s32.totalorder %v1876_v11, 15 }
 0x2dd   : > { %v1144_v8 = vmax.f32 %v1112_v0, %v1136_v42  ;;  %v1168_v29 = vrot.slane %v1160_v10, 5  ;;  %vm2976_vm3 = vcmp.lt.s32.totalorder %v1895_v20, 15  ;;  %v1198_v4 = vrot.slane %v1190_v22, 5  ;;  %vm2980_vm14 = vmmov %vm2970_vm5  ;;  %v2986_v42 = vld [vmem:[#allocation21_spill] sm:$0xff] }
 0x2de   : > { %v1143_v52 = vmax.f32 %v1111_v50, %v1135_v25  ;;  %vm636_vm4 = vcmp.gt.f32.partialorder %v2977_v36, 0.1  ;;  %vm2982_vm15 = vnez %v2981_v46  ;;  %vm2984_vm12 = vnez %v2983_v30 }
 0x2df   : > { %v1212_v23 = vpop.permute.xlu1 %1211  ;;  %v1150_v55 = vpop.permute.xlu0 %1149  ;;  %v1176_v32 = vmax.f32 %v1144_v8, %v1168_v29 }
 0x2e0   : > { %v1218_v28 = vsel %vm2970_vm5, %v1212_v23, %v1214_v49  ;;  %v1219_v35 = vsel %vm2971_vm10, %v2562_v21, %v1212_v23  ;;  %v1153_v41 = vsel %vm2972_vm13, %v1150_v55, %v2585_v57  ;;  %v1154_v61 = vsel %vm2973_vm8, %v2530_v40, %v1150_v55 }
 0x2e1   : > { %v1221_v12 = vsel %vm2921_vm9, %v1219_v35, 0.0  ;;  %v1158_v15 = vsel %vm2187_vm2, %v1154_v61, 0.0  ;;  %v1159_v51 = vsel %vm2974_vm0, %v1153_v41, 0.0  ;;  %v1192_v57 = vsel %vm2975_vm1, %v1188_v16, 0.0 }
 0x2e2   : > { %v1229_v27 = vrot.slane %v1221_v12, 5  ;;  %v1166_v18 = vrot.slane %v1158_v15, 5  ;;  %v1167_v62 = vrot.slane %v1159_v51, 5  ;;  %v1191_v40 = vsel %vm2976_vm3, %v1185_v2, 0.0 }
 0x2e3   : > { %v1222_v26 = vsel %vm2924_vm11, %v1218_v28, 0.0  ;;  %vm635_vm2 = vcmp.gt.f32.partialorder %v2464_v7, 0.1  ;;  %v1200_v11 = vrot.slane %v1192_v57, 5  ;;  %v1199_v13 = vrot.slane %v1191_v40, 5  ;;  %vm2979_vm11 = vmmov %vm2970_vm5 }
 0x2e4   : > { %v1237_v19 = vmax.f32 %v1205_v17, %v1229_v27  ;;  %v1174_v63 = vmax.f32 %v1142_v14, %v1166_v18  ;;  %v1230_v44 = vrot.slane %v1222_v26, 5  ;;  %v1175_v38 = vmax.f32 %v1143_v52, %v1167_v62 }
 0x2e5   : > { %v1208_v58 = vmax.f32 %v1176_v32, %v1200_v11  ;;  %vm637_vm13 = vcmp.gt.f32.partialorder %v2985_v5, 0.1  ;;  %vm638_vm3 = vcmp.gt.f32.partialorder %v2986_v42, 0.1 }
 0x2e6   : > { %vm1241_vm9 = vcmp.gt.f32.partialorder %v1237_v19, 0.1  ;;  %v1206_v37 = vmax.f32 %v1174_v63, %v1198_v4  ;;  %v1207_v48 = vmax.f32 %v1175_v38, %v1199_v13 }
 0x2e7   : > { %vm1245_vm7 = vmand %vm635_vm2, %vm1241_vm9  ;;  %v1216_v20 = vpop.permute.xlu0 %1215 }
 0x2e8   : > { %v1249_v39 = vsel %vm1245_vm7, 1, %v2978_v45  ;;  %v1238_v60 = vmax.f32 %v1206_v37, %v1230_v44  ;;  %v1217_v9 = vsel %vm2979_vm11, %v1214_v49, %v1216_v20  ;;  %v1220_v7 = vsel %vm2980_vm14, %v1216_v20, %v2562_v21 }
 0x2e9   : > { %v1253_v24 = vperm.slane %v1249_v39, 3  ;;  %v1223_v43 = vsel %vm2982_vm15, %v1217_v9, 0.0  ;;  %v1224_v34 = vsel %vm2984_vm12, %v1220_v7, 0.0 }
 0x2ea   : > { %vm1242_vm6 = vcmp.gt.f32.partialorder %v1238_v60, 0.1  ;;  %v1231_v1 = vrot.slane %v1223_v43, 5  ;;  %v1232_v59 = vrot.slane %v1224_v34, 5 }
 0x2eb   : > { %vm1257_vm5 = vcmp.eq.s32.totalorder %v1253_v24, 1  ;;  %vm1246_vm10 = vmand %vm636_vm4, %vm1242_vm6 }
 0x2ec   : > { %v1261_v6 = vsel %vm1257_vm5, %v2481_v47, 0.0  ;;  %v1250_v21 = vsel %vm1246_vm10, 1, %v2978_v45  ;;  %v1239_v31 = vmax.f32 %v1207_v48, %v1231_v1  ;;  %v1240_v3 = vmax.f32 %v1208_v58, %v1232_v59 }
 0x2ed   : > { %1265 = vst [vmem:[%s298_s29] sm:$0xff] %v1261_v6  ;;  %v1254_v14 = vperm.slane %v1250_v21, 3 }
 0x2ee   : > { %vm1243_vm8 = vcmp.gt.f32.partialorder %v1239_v31, 0.1  ;;  %vm1244_vm0 = vcmp.gt.f32.partialorder %v1240_v3, 0.1 }
 0x2ef   : > { %vm1258_vm1 = vcmp.eq.s32.totalorder %v1254_v14, 1  ;;  %vm1247_vm2 = vmand %vm637_vm13, %vm1243_vm8 }
 0x2f0   : > { %v1262_v47 = vsel %vm1258_vm1, %v2484_v33, 0.0  ;;  %vm1248_vm9 = vmand %vm638_vm3, %vm1244_vm0  ;;  %v1251_v16 = vsel %vm1247_vm2, 1, %v2978_v45 }
 0x2f1   : > { %1266 = vst [vmem:[%s298_s29 + $0x8] sm:$0xff] %v1262_v47  ;;  %v1252_v10 = vsel %vm1248_vm9, 1, %v2978_v45  ;;  %v1255_v49 = vperm.slane %v1251_v16, 3 }
 0x2f2   : > { %v1256_v50 = vperm.slane %v1252_v10, 3 }
 0x2f3   : > { %vm1259_vm7 = vcmp.eq.s32.totalorder %v1255_v49, 1 }
 0x2f4   : > { %vm1260_vm4 = vcmp.eq.s32.totalorder %v1256_v50, 1  ;;  %v1263_v54 = vsel %vm1259_vm7, %v2501_v53, 0.0 }
 0x2f5   : > { %v1264_v33 = vsel %vm1260_vm4, %v2508_v56, 0.0  ;;  %1267 = vst [vmem:[%s298_s29 + $0x10] sm:$0xff] %v1263_v54 }
 0x2f6   : > { %1268 = vst [vmem:[%s298_s29 + $0x18] sm:$0xff] %v1264_v33 }
 0x2f7   : > { %1602 = shalt.err (!%p1599_p12)
}
 0x2f8   : > { %1452 = dma.vmem_to_hbm [thread:$0]  (%p1758_p3), %s1284_s25, 512, %s1286_s30, %s1270_s10  }
 0x2f9 PF: > { %s1297_s16 = sand.u32 1, %s1633_s21   ;;  %p2987_p13 = scmp.ge.s32.totalorder %s1645_s24, 2 }
 0x2fa   : > { %s1298_s8 = scalar_lea.sflag [#allocation5], %s1297_s16 }
 0x2fb   : > { %p1463_p0 = pnand %p2987_p13, %p1727_p6 }
 0x2fd   : > { %p1464_p5 = pneg %p1463_p0 }
 0x2ff   : > { %1628 = dma.done.wait (%p1464_p5), %s1298_s8, 512  }
 0x300   : > { %1630 = vsyncadd (%p1464_p5), %s1298_s8, 4294966784  ;;  %p20_p7 = scmp.ge.s32.totalorder %s1745_s11, 4   ;;  %s2988_s21 = smov %s1637_s22 }
 0x301   : > { %s2989_s22 = smov %s1641_s23  ;;  %s2990_s23 = smov %s1754_s14 }
 0x302   : > { %s2991_s24 = smov %s1745_s11  ;;  %22 = sbr.rel (!%p20_p7) target bundleno = 6 (0x6), region = 96 }
 0x307   :  { %1304 = vsyncpa [#allocation4], 1 }
 0x308   :  { %1306 = vsyncpa [#allocation4 + $0x1], 1 }
 0x309   :  { %1307 = vsyncpa [#allocation7], 1 }
 0x30a   :  { %1308 = vsyncpa [#allocation5], 1 }
 0x30b   :  { %1310 = vsyncpa [#allocation5 + $0x1], 1 }

</bundles_post_ra>
